<compile_context>
chip_gen: v5e
topology: v5e:2x2
jax: 0.10.0
libtpu: 0.0.40
codegen_flags: <defaults>
</compile_context>

<pallas_src>
import functools

import jax
import jax.numpy as jnp
from jax.experimental import pallas as pl
from jax.experimental.pallas import tpu as pltpu


# ----------------------------------------------------------------------------
# VMEM budgeting / tile selection
# ----------------------------------------------------------------------------
def _vmem_limit_bytes():
    """Scoped-VMEM limit to request: conservative fraction of physical VMEM."""
    try:
        cap = pltpu.get_tpu_info().vmem_capacity_bytes
    except Exception:
        cap = 64 * 1024 * 1024  # assume the smallest (v7x) when query fails
    return int(min(int(cap * 0.75), 96 << 20))


def _attn_vmem_bytes(tq, n, num_heads, width):
    """Rough VMEM footprint of the attention kernel for a dst tile of TQ rows."""
    resident = 2 * n * width * 2          # xh bf16 (count double-buffer, conservative)
    resident += 2 * num_heads * n * 4     # a_src^T f32
    per_tile = 2 * tq * n                 # adj int8, double buffered
    per_tile += 2 * tq * width * 4        # out tile f32, double buffered
    per_tile += 2 * tq * num_heads * 4    # a_dst tile f32, double buffered
    temps = 4 * tq * n * 4 + tq * n * 2   # ~4 live f32 (TQ,N) temps + bf16 exp
    return resident + per_tile + temps + (1 << 20)


_TILE_CANDIDATES = (1024, 512, 256, 128, 64, 32, 16, 8)


def _pick_dst_tile(n, num_heads, width, budget):
    """Largest dst-row tile (divisor of n) that fits the VMEM budget; prefer
    >= 2 grid steps so megacore (v7x) can shard the dst axis."""
    divisors = [t for t in _TILE_CANDIDATES if t <= n and n % t == 0]
    fitting = [t for t in divisors if _attn_vmem_bytes(t, n, num_heads, width) <= budget]
    multi = [t for t in fitting if n // t >= 2]
    if multi:
        return multi[0]
    if fitting:
        return fitting[0]
    if divisors:
        return divisors[-1]
    return n  # n not a multiple of 8: single full block (block == full dim is legal)


def _pick_row_tile(n):
    """Row tile for the cheap projection / pooling kernels."""
    for t in (512, 256, 128, 64, 32, 16, 8):
        if t <= n and n % t == 0:
            return t
    return n


# ----------------------------------------------------------------------------
# Kernel 1: per-layer projection (all heads + folded attention vectors), once
# per layer.  One bf16 MXU matmul per node-row tile.
#   x_ref    : (TN, Fin)           bf16
#   wbig_ref : (Fin, H*Fout + 2H)  bf16   [W_all | W@att_src | W@att_dst]
#   xh_ref   : (TN, H*Fout)        bf16 output (aggregation operand)
#   att_ref  : (TN, 2H)            f32 output  [a_src | a_dst]
# ----------------------------------------------------------------------------
def gat_project_kernel(x_ref, wbig_ref, xh_ref, att_ref, *, width):
    p = jnp.dot(x_ref[...], wbig_ref[...], preferred_element_type=jnp.float32)
    xh_ref[...] = p[:, :width].astype(jnp.bfloat16)
    att_ref[...] = p[:, width:]


def gat_project(x_bf16, w_big, width, num_heads, vmem_limit):
    n, fin = x_bf16.shape
    pcols = w_big.shape[1]
    tn = _pick_row_tile(n)
    kernel = functools.partial(gat_project_kernel, width=width)
    return pl.pallas_call(
        kernel,
        out_shape=(jax.ShapeDtypeStruct((n, width), jnp.bfloat16),
                   jax.ShapeDtypeStruct((n, 2 * num_heads), jnp.float32)),
        grid=(n // tn,),
        in_specs=[
            pl.BlockSpec((tn, fin), lambda i: (i, 0)),
            pl.BlockSpec((fin, pcols), lambda i: (0, 0)),
        ],
        out_specs=[
            pl.BlockSpec((tn, width), lambda i: (i, 0)),
            pl.BlockSpec((tn, 2 * num_heads), lambda i: (i, 0)),
        ],
        compiler_params=pltpu.CompilerParams(
            dimension_semantics=("parallel",),
            vmem_limit_bytes=vmem_limit),
    )(x_bf16, w_big)


# ----------------------------------------------------------------------------
# Kernel 2: per-layer attention + aggregation + bias/ReLU/eval-BN epilogue for
# one tile of destination rows.  Projections are NOT recomputed here.
#   adj_ref   : (TQ, N)  int8   adj[dst, src] != 0 iff edge src -> dst (0/1)
#   adst_ref  : (TQ, H)  f32    per-dst-node attention scalars
#   asrcT_ref : (H, N)   f32    per-src-node attention scalars (transposed)
#   xh_ref    : (N, H*Fout) bf16  projected features (resident across tiles)
#   bias/scale/shift_ref : (H, Fout) f32 fused epilogue parameters
#   out_ref   : (TQ, H*Fout) f32 lane-dense output tile
# ----------------------------------------------------------------------------
def gat_attn_kernel(adj_ref, adst_ref, asrcT_ref, xh_ref,
                    bias_ref, scale_ref, shift_ref, out_ref, *, num_heads, fout):
    # One additive mask bias for all heads (adj is a 0/1 predicate).
    adjf = adj_ref[...].astype(jnp.float32)
    mask_bias = jnp.where(adjf > 0.5, 0.0, -1e30)          # (TQ, N) f32

    adst = adst_ref[...]                                    # (TQ, H)
    asrcT = asrcT_ref[...]                                  # (H, N)
    xh = xh_ref[...]                                        # (N, H*Fout) bf16

    for h in range(num_heads):                              # static unroll (H small)
        # logits[i, j] = a_dst[i] + a_src[j]   (message j -> i)
        logits = adst[:, h:h + 1] + asrcT[h:h + 1, :]       # (TQ, N)
        # LeakyReLU(0.2) as in PyG GATConv.
        logits = jnp.where(logits > 0, logits, 0.2 * logits)
        masked = logits + mask_bias
        # Clamp the row max so fully-masked (isolated) rows keep exp -> 0.
        m = jnp.maximum(jnp.max(masked, axis=-1, keepdims=True), -1e4)
        e = jnp.exp((masked - m).astype(jnp.bfloat16))      # bf16 EUP; non-edges -> 0
        denom = jnp.sum(e.astype(jnp.float32), axis=-1, keepdims=True)
        inv = pl.reciprocal(jnp.maximum(denom, 1e-30), approx=True)
        # Aggregate un-normalized, fold 1/denom after the matmul (row-wise linear).
        y = jnp.dot(e, xh[:, h * fout:(h + 1) * fout],
                    preferred_element_type=jnp.float32)     # (TQ, Fout)
        y = y * inv
        # Fused epilogue: GATConv bias -> ReLU -> eval-mode BatchNorm.
        y = jnp.maximum(y + bias_ref[h:h + 1, :], 0.0)
        out_ref[:, h * fout:(h + 1) * fout] = (
            y * scale_ref[h:h + 1, :] + shift_ref[h:h + 1, :])


def gat_attention(adj_i8, a_dst, a_src_t, xh, bias, scale, shift,
                  num_heads, fout, vmem_limit):
    n = adj_i8.shape[0]
    width = num_heads * fout
    budget = int(0.7 * vmem_limit)
    tq = _pick_dst_tile(n, num_heads, width, budget)
    kernel = functools.partial(gat_attn_kernel, num_heads=num_heads, fout=fout)
    # NOTE: pl.Buffered(3) on the adj spec is an option once the adj DMA is the
    # exposed per-step transfer; left at the default 2-deep pipeline here.
    return pl.pallas_call(
        kernel,
        out_shape=jax.ShapeDtypeStruct((n, width), jnp.float32),
        grid=(n // tq,),
        in_specs=[
            pl.BlockSpec((tq, n), lambda q: (q, 0)),            # adj rows (int8)
            pl.BlockSpec((tq, num_heads), lambda q: (q, 0)),    # a_dst rows
            pl.BlockSpec((num_heads, n), lambda q: (0, 0)),     # a_src^T (resident)
            pl.BlockSpec((n, width), lambda q: (0, 0)),         # xh (resident, bf16)
            pl.BlockSpec((num_heads, fout), lambda q: (0, 0)),  # bias
            pl.BlockSpec((num_heads, fout), lambda q: (0, 0)),  # BN scale
            pl.BlockSpec((num_heads, fout), lambda q: (0, 0)),  # BN shift
        ],
        out_specs=pl.BlockSpec((tq, width), lambda q: (q, 0)),
        compiler_params=pltpu.CompilerParams(
            dimension_semantics=("parallel",),
            vmem_limit_bytes=vmem_limit),
    )(adj_i8, a_dst, a_src_t, xh, bias, scale, shift)


def gat_conv_fused(x, adj_i8, w, att_src, att_dst, bias, bn_params, eps=1e-5):
    """GATConv (all heads) + bias + ReLU + eval-mode BatchNorm (two kernels).

    x: (N, Fin) f32; adj_i8: (N, N) int8 0/1 mask adj[dst, src]
    w: (H, Fin, Fout); att_src/att_dst: (H, Fout); bias: (H*Fout,)
    bn_params = (gamma, beta, running_mean, running_var), each (H*Fout,).
    concat=False with heads=1 (conv3) is numerically identical to concat=True.
    """
    gamma, beta, rmean, rvar = bn_params
    num_heads, fin, fout = w.shape
    width = num_heads * fout
    vmem_limit = _vmem_limit_bytes()

    # Parameter folding outside the kernels (tiny, fused by XLA).
    w_all = jnp.transpose(w, (1, 0, 2)).reshape(fin, width)   # (Fin, H*Fout)
    wsrc = jnp.einsum("hif,hf->ih", w, att_src)               # (Fin, H)
    wdst = jnp.einsum("hif,hf->ih", w, att_dst)               # (Fin, H)
    w_big = jnp.concatenate([w_all, wsrc, wdst], axis=1).astype(jnp.bfloat16)
    scale_flat = gamma * jax.lax.rsqrt(rvar + eps)            # fused eval-BN
    shift_flat = beta - rmean * scale_flat
    bias2 = bias.reshape(num_heads, fout)
    scale2 = scale_flat.reshape(num_heads, fout)
    shift2 = shift_flat.reshape(num_heads, fout)

    # Stage 1: projection once per layer (bf16 MXU, f32 accumulation).
    xh, att = gat_project(x.astype(jnp.bfloat16), w_big, width, num_heads,
                          vmem_limit)
    a_src_t = jnp.transpose(att[:, :num_heads])               # (H, N)
    a_dst = att[:, num_heads:]                                # (N, H)

    # Stage 2: attention + aggregation + fused epilogue, tiled over dst rows.
    return gat_attention(adj_i8, a_dst, a_src_t, xh, bias2, scale2, shift2,
                         num_heads, fout, vmem_limit)


# ----------------------------------------------------------------------------
# Kernel 3: global_mean_pool (pooling-matrix matmul, reduction grid over node
# tiles with a VMEM accumulator) fused with the final fc.
# ----------------------------------------------------------------------------
def pool_fc_kernel(p_ref, x_ref, w_ref, b_ref, o_ref, acc_ref):
    @pl.when(pl.program_id(0) == 0)
    def _init():
        acc_ref[...] = jnp.zeros_like(acc_ref)

    acc_ref[...] += jnp.dot(p_ref[...], x_ref[...],
                            preferred_element_type=jnp.float32)

    @pl.when(pl.program_id(0) == pl.num_programs(0) - 1)
    def _finish():
        o_ref[...] = jnp.dot(acc_ref[...].astype(jnp.bfloat16), w_ref[...],
                             preferred_element_type=jnp.float32) + b_ref[...]


def pool_and_fc(pool_mat, x, fc_w, fc_b):
    num_graphs, n = pool_mat.shape
    feat = x.shape[1]
    num_classes = fc_w.shape[1]
    tn = _pick_row_tile(n)
    return pl.pallas_call(
        pool_fc_kernel,
        out_shape=jax.ShapeDtypeStruct((num_graphs, num_classes), jnp.float32),
        grid=(n // tn,),
        in_specs=[
            pl.BlockSpec((num_graphs, tn), lambda k: (0, k)),
            pl.BlockSpec((tn, feat), lambda k: (k, 0)),
            pl.BlockSpec((feat, num_classes), lambda k: (0, 0)),
            pl.BlockSpec((1, num_classes), lambda k: (0, 0)),
        ],
        out_specs=pl.BlockSpec((num_graphs, num_classes), lambda k: (0, 0)),
        scratch_shapes=[pltpu.VMEM((num_graphs, feat), jnp.float32)],
        compiler_params=pltpu.CompilerParams(
            dimension_semantics=("arbitrary",),
            vmem_limit_bytes=_vmem_limit_bytes()),
    )(pool_mat.astype(jnp.bfloat16), x.astype(jnp.bfloat16),
      fc_w.astype(jnp.bfloat16), fc_b.reshape(1, num_classes))


# ----------------------------------------------------------------------------
# Forward pass (inference). Dropout = identity.
# ----------------------------------------------------------------------------
def gat_forward(x, adj_i8, pool_mat, params):
    h = gat_conv_fused(x, adj_i8, params["w1"], params["as1"], params["ad1"],
                       params["b1"], params["bn1"])
    h = gat_conv_fused(h, adj_i8, params["w2"], params["as2"], params["ad2"],
                       params["b2"], params["bn2"])
    h = gat_conv_fused(h, adj_i8, params["w3"], params["as3"], params["ad3"],
                       params["b3"], params["bn3"])
    # TODO(synk): for very large graphs, fuse the mean-pool accumulation into
    # the layer-3 epilogue to save one HBM round trip of h.
    return pool_and_fc(pool_mat, h, params["fc_w"], params["fc_b"])


def init_params(key, in_channels, hidden, heads, num_classes):
    ks = jax.random.split(key, 24)
    k = iter(ks)

    def lin(key_, fin, h, fo):
        # stored as (H, Fin, Fout): per-head slice of the GATConv linear map
        return 0.2 * jax.random.normal(key_, (h, fin, fo), jnp.float32)

    def att(key_, h, fo):
        return 0.2 * jax.random.normal(key_, (h, fo), jnp.float32)

    def bn(key_, n):
        k1, k2, k3, k4 = jax.random.split(key_, 4)
        gamma = 1.0 + 0.1 * jax.random.normal(k1, (n,), jnp.float32)
        beta = 0.1 * jax.random.normal(k2, (n,), jnp.float32)
        rmean = 0.05 * jax.random.normal(k3, (n,), jnp.float32)
        rvar = 1.0 + 0.1 * jax.random.uniform(k4, (n,), jnp.float32)
        return (gamma, beta, rmean, rvar)

    p = {}
    # conv1: in_channels -> hidden, heads, concat
    p["w1"] = lin(next(k), in_channels, heads, hidden)
    p["as1"] = att(next(k), heads, hidden)
    p["ad1"] = att(next(k), heads, hidden)
    p["b1"] = 0.1 * jax.random.normal(next(k), (heads * hidden,), jnp.float32)
    p["bn1"] = bn(next(k), heads * hidden)
    # conv2: heads*hidden -> hidden, 4 heads, concat
    p["w2"] = lin(next(k), heads * hidden, 4, hidden)
    p["as2"] = att(next(k), 4, hidden)
    p["ad2"] = att(next(k), 4, hidden)
    p["b2"] = 0.1 * jax.random.normal(next(k), (4 * hidden,), jnp.float32)
    p["bn2"] = bn(next(k), 4 * hidden)
    # conv3: 4*hidden -> hidden, 1 head, concat=False
    p["w3"] = lin(next(k), 4 * hidden, 1, hidden)
    p["as3"] = att(next(k), 1, hidden)
    p["ad3"] = att(next(k), 1, hidden)
    p["b3"] = 0.1 * jax.random.normal(next(k), (hidden,), jnp.float32)
    p["bn3"] = bn(next(k), hidden)
    # fc: hidden -> num_classes
    p["fc_w"] = 0.2 * jax.random.normal(next(k), (hidden, num_classes), jnp.float32)
    p["fc_b"] = 0.1 * jax.random.normal(next(k), (num_classes,), jnp.float32)
    return p


if __name__ == "__main__":
    key = jax.random.PRNGKey(0)
    kx, kp = jax.random.split(key)

    # Small synthetic graph batch: 2 graphs x 8 nodes, 4 input features.
    IN_CH, HIDDEN, HEADS, NUM_CLASSES = 4, 8, 4, 3
    NODES_PER_GRAPH, NUM_GRAPHS = 8, 2
    N = NODES_PER_GRAPH * NUM_GRAPHS

    x = jax.random.normal(kx, (N, IN_CH), jnp.float32)

    # Deterministic edge_index: bidirectional ring inside each graph.
    # (The module uses add_self_loops=False, so no self-loops are added.)
    src, dst = [], []
    for g in range(NUM_GRAPHS):
        base = g * NODES_PER_GRAPH
        for i in range(NODES_PER_GRAPH):
            a, b = base + i, base + (i + 1) % NODES_PER_GRAPH
            src += [a, b]
            dst += [b, a]
    edge_index = jnp.array([src, dst], dtype=jnp.int32)        # [2, E], row0=src

    # Dense 0/1 adjacency in int8: adj[dst, src] = 1 (messages src -> dst).
    adj = jnp.zeros((N, N), jnp.int8).at[edge_index[1], edge_index[0]].set(1)

    # batch vector and the mean-pool matrix it induces.
    batch = jnp.repeat(jnp.arange(NUM_GRAPHS, dtype=jnp.int32), NODES_PER_GRAPH)
    onehot = (batch[None, :] == jnp.arange(NUM_GRAPHS)[:, None]).astype(jnp.float32)
    pool_mat = onehot / jnp.sum(onehot, axis=1, keepdims=True)  # (G, N)

    params = init_params(kp, IN_CH, HIDDEN, HEADS, NUM_CLASSES)

    out = jax.jit(gat_forward)(x, adj, pool_mat, params)
    out = jax.block_until_ready(out)
    assert out.shape == (NUM_GRAPHS, NUM_CLASSES)
    assert bool(jnp.all(jnp.isfinite(out)))
    print("KERNEL_OK")
</pallas_src>

<mosaic_0001>
module attributes {stable_mosaic.version = 11 : i64} {
  func.func @gat_project_kernel(%arg0: i32, %arg1: memref<16x4xbf16, #tpu.memory_space<vmem>>, %arg2: memref<4x40xbf16, #tpu.memory_space<vmem>>, %arg3: memref<16x32xbf16, #tpu.memory_space<vmem>>, %arg4: memref<16x8xf32, #tpu.memory_space<vmem>>) attributes {dimension_semantics = [#tpu.dimension_semantics<parallel>], iteration_bounds = array<i64: 1>, scalar_prefetch = 0 : i64, scratch_operands = 0 : i64, tpu.core_type = #tpu.core_type<tc>, window_params = [{transform_indices = @transform_0, window_bounds = array<i64: 16, 4>}, {pipeline_mode = #tpu.pipeline_mode<synchronous>, transform_indices = @transform_1, window_bounds = array<i64: 4, 40>}, {transform_indices = @transform_2, window_bounds = array<i64: 16, 32>}, {transform_indices = @transform_3, window_bounds = array<i64: 16, 8>}]} {
    %c0 = arith.constant 0 : index
    %c0_0 = arith.constant 0 : index
    %0 = vector.load %arg1[%c0, %c0_0] : memref<16x4xbf16, #tpu.memory_space<vmem>>, vector<16x4xbf16>
    %c0_1 = arith.constant 0 : index
    %c0_2 = arith.constant 0 : index
    %1 = vector.load %arg2[%c0_1, %c0_2] : memref<4x40xbf16, #tpu.memory_space<vmem>>, vector<4x40xbf16>
    %cst = arith.constant dense<0.000000e+00> : vector<16x40xf32>
    %2 = tpu.matmul %0, %1, %cst {dimension_numbers = #tpu.dot_dimension_numbers<[1], [0], [0], [1], [0, 0, 1, 1], [], []>} : vector<16x4xbf16>, vector<4x40xbf16>, vector<16x40xf32> -> vector<16x40xf32>
    %3 = vector.extract_strided_slice %2 {offsets = [0, 0], sizes = [16, 32], strides = [1, 1]} : vector<16x40xf32> to vector<16x32xf32>
    %4 = arith.truncf %3 : vector<16x32xf32> to vector<16x32xbf16>
    %c0_3 = arith.constant 0 : index
    %c0_4 = arith.constant 0 : index
    %5 = vector.load %arg3[%c0_3, %c0_4] : memref<16x32xbf16, #tpu.memory_space<vmem>>, vector<16x32xbf16>
    tpu.vector_store %arg3[%c0_3, %c0_4], %4 {strides = array<i32>} : memref<16x32xbf16, #tpu.memory_space<vmem>>, vector<16x32xbf16>,
    %6 = vector.extract_strided_slice %2 {offsets = [0, 32], sizes = [16, 8], strides = [1, 1]} : vector<16x40xf32> to vector<16x8xf32>
    %c0_5 = arith.constant 0 : index
    %c0_6 = arith.constant 0 : index
    %7 = vector.load %arg4[%c0_5, %c0_6] : memref<16x8xf32, #tpu.memory_space<vmem>>, vector<16x8xf32>
    tpu.vector_store %arg4[%c0_5, %c0_6], %6 {strides = array<i32>} : memref<16x8xf32, #tpu.memory_space<vmem>>, vector<16x8xf32>,
    return
  }
  func.func @transform_0(%arg0: i32) -> (i32, i32) {
    %c0_i32 = arith.constant 0 : i32
    %c0_i32_0 = arith.constant 0 : i32
    return %arg0, %c0_i32 : i32, i32
  }
  func.func @transform_1(%arg0: i32) -> (i32, i32) {
    %c0_i32 = arith.constant 0 : i32
    %c0_i32_0 = arith.constant 0 : i32
    %c0_i32_1 = arith.constant 0 : i32
    return %c0_i32, %c0_i32_0 : i32, i32
  }
  func.func @transform_2(%arg0: i32) -> (i32, i32) {
    %c0_i32 = arith.constant 0 : i32
    %c0_i32_0 = arith.constant 0 : i32
    return %arg0, %c0_i32 : i32, i32
  }
  func.func @transform_3(%arg0: i32) -> (i32, i32) {
    %c0_i32 = arith.constant 0 : i32
    %c0_i32_0 = arith.constant 0 : i32
    return %arg0, %c0_i32 : i32, i32
  }
}

module attributes {stable_mosaic.version = 11 : i64} {
  func.func @gat_attn_kernel(%arg0: i32, %arg1: memref<8x16xi8, #tpu.memory_space<vmem>>, %arg2: memref<8x4xf32, #tpu.memory_space<vmem>>, %arg3: memref<4x16xf32, #tpu.memory_space<vmem>>, %arg4: memref<16x32xbf16, #tpu.memory_space<vmem>>, %arg5: memref<4x8xf32, #tpu.memory_space<vmem>>, %arg6: memref<4x8xf32, #tpu.memory_space<vmem>>, %arg7: memref<4x8xf32, #tpu.memory_space<vmem>>, %arg8: memref<8x32xf32, #tpu.memory_space<vmem>>) attributes {dimension_semantics = [#tpu.dimension_semantics<parallel>], iteration_bounds = array<i64: 2>, scalar_prefetch = 0 : i64, scratch_operands = 0 : i64, tpu.core_type = #tpu.core_type<tc>, window_params = [{transform_indices = @transform_0, window_bounds = array<i64: 8, 16>}, {transform_indices = @transform_1, window_bounds = array<i64: 8, 4>}, {pipeline_mode = #tpu.pipeline_mode<synchronous>, transform_indices = @transform_2, window_bounds = array<i64: 4, 16>}, {pipeline_mode = #tpu.pipeline_mode<synchronous>, transform_indices = @transform_3, window_bounds = array<i64: 16, 32>}, {pipeline_mode = #tpu.pipeline_mode<synchronous>, transform_indices = @transform_4, window_bounds = array<i64: 4, 8>}, {pipeline_mode = #tpu.pipeline_mode<synchronous>, transform_indices = @transform_5, window_bounds = array<i64: 4, 8>}, {pipeline_mode = #tpu.pipeline_mode<synchronous>, transform_indices = @transform_6, window_bounds = array<i64: 4, 8>}, {transform_indices = @transform_7, window_bounds = array<i64: 8, 32>}]} {
    %c0 = arith.constant 0 : index
    %c0_0 = arith.constant 0 : index
    %0 = vector.load %arg1[%c0, %c0_0] : memref<8x16xi8, #tpu.memory_space<vmem>>, vector<8x16xi8>
    %1 = arith.sitofp %0 : vector<8x16xi8> to vector<8x16xf32>
    %cst = arith.constant 5.000000e-01 : f32
    %2 = vector.broadcast %cst : f32 to vector<8x16xf32>
    %3 = arith.cmpf ogt, %1, %2 : vector<8x16xf32>
    %cst_1 = arith.constant 0.000000e+00 : f32
    %cst_2 = arith.constant -1.000000e+30 : f32
    %4 = vector.broadcast %cst_1 : f32 to vector<8x16xf32>
    %5 = vector.broadcast %cst_2 : f32 to vector<8x16xf32>
    %6 = arith.select %3, %4, %5 : vector<8x16xi1>, vector<8x16xf32>
    %c0_3 = arith.constant 0 : index
    %c0_4 = arith.constant 0 : index
    %7 = vector.load %arg2[%c0_3, %c0_4] : memref<8x4xf32, #tpu.memory_space<vmem>>, vector<8x4xf32>
    %c0_5 = arith.constant 0 : index
    %c0_6 = arith.constant 0 : index
    %8 = vector.load %arg3[%c0_5, %c0_6] : memref<4x16xf32, #tpu.memory_space<vmem>>, vector<4x16xf32>
    %c0_7 = arith.constant 0 : index
    %c0_8 = arith.constant 0 : index
    %9 = vector.load %arg4[%c0_7, %c0_8] : memref<16x32xbf16, #tpu.memory_space<vmem>>, vector<16x32xbf16>
    %10 = vector.extract_strided_slice %7 {offsets = [0, 0], sizes = [8, 1], strides = [1, 1]} : vector<8x4xf32> to vector<8x1xf32>
    %11 = vector.extract_strided_slice %8 {offsets = [0, 0], sizes = [1, 16], strides = [1, 1]} : vector<4x16xf32> to vector<1x16xf32>
    %12 = vector.broadcast %10 : vector<8x1xf32> to vector<8x16xf32>
    %13 = vector.broadcast %11 : vector<1x16xf32> to vector<8x16xf32>
    %14 = arith.addf %12, %13 : vector<8x16xf32>
    %cst_9 = arith.constant 0.000000e+00 : f32
    %15 = vector.broadcast %cst_9 : f32 to vector<8x16xf32>
    %16 = arith.cmpf ogt, %14, %15 : vector<8x16xf32>
    %cst_10 = arith.constant 2.000000e-01 : f32
    %17 = vector.broadcast %cst_10 : f32 to vector<8x16xf32>
    %18 = arith.mulf %17, %14 : vector<8x16xf32>
    %19 = arith.select %16, %14, %18 : vector<8x16xi1>, vector<8x16xf32>
    %20 = arith.addf %19, %6 : vector<8x16xf32>
    %cst_11 = arith.constant dense<0xFF800000> : vector<8xf32>
    %21 = vector.multi_reduction <maximumf>, %20, %cst_11 [1] : vector<8x16xf32> to vector<8xf32>
    %22 = vector.shape_cast %21 : vector<8xf32> to vector<8x1xf32>
    %cst_12 = arith.constant -1.000000e+04 : f32
    %23 = vector.broadcast %cst_12 : f32 to vector<8x1xf32>
    %24 = arith.maximumf %22, %23 : vector<8x1xf32>
    %25 = vector.broadcast %24 : vector<8x1xf32> to vector<8x16xf32>
    %26 = arith.subf %20, %25 : vector<8x16xf32>
    %27 = arith.truncf %26 : vector<8x16xf32> to vector<8x16xbf16>
    %28 = math.exp %27 : vector<8x16xbf16>
    %29 = arith.extf %28 : vector<8x16xbf16> to vector<8x16xf32>
    %cst_13 = arith.constant dense<0.000000e+00> : vector<8xf32>
    %30 = vector.multi_reduction <add>, %29, %cst_13 [1] : vector<8x16xf32> to vector<8xf32>
    %31 = vector.shape_cast %30 : vector<8xf32> to vector<8x1xf32>
    %cst_14 = arith.constant 1.000000e-30 : f32
    %32 = vector.broadcast %cst_14 : f32 to vector<8x1xf32>
    %33 = arith.maximumf %31, %32 : vector<8x1xf32>
    %34 = tpu.reciprocal %33 {approx = true} : vector<8x1xf32> -> vector<8x1xf32>
    %35 = vector.extract_strided_slice %9 {offsets = [0, 0], sizes = [16, 8], strides = [1, 1]} : vector<16x32xbf16> to vector<16x8xbf16>
    %cst_15 = arith.constant dense<0.000000e+00> : vector<8x8xf32>
    %36 = tpu.matmul %28, %35, %cst_15 {dimension_numbers = #tpu.dot_dimension_numbers<[1], [0], [0], [1], [0, 0, 1, 1], [], []>} : vector<8x16xbf16>, vector<16x8xbf16>, vector<8x8xf32> -> vector<8x8xf32>
    %37 = vector.broadcast %34 : vector<8x1xf32> to vector<8x8xf32>
    %38 = arith.mulf %36, %37 : vector<8x8xf32>
    %c0_16 = arith.constant 0 : index
    %c0_17 = arith.constant 0 : index
    %39 = vector.load %arg5[%c0_16, %c0_17] : memref<4x8xf32, #tpu.memory_space<vmem>>, vector<1x8xf32>
    %40 = vector.broadcast %39 : vector<1x8xf32> to vector<8x8xf32>
    %41 = arith.addf %38, %40 : vector<8x8xf32>
    %cst_18 = arith.constant 0.000000e+00 : f32
    %42 = vector.broadcast %cst_18 : f32 to vector<8x8xf32>
    %43 = arith.maximumf %41, %42 : vector<8x8xf32>
    %c0_19 = arith.constant 0 : index
    %c0_20 = arith.constant 0 : index
    %44 = vector.load %arg6[%c0_19, %c0_20] : memref<4x8xf32, #tpu.memory_space<vmem>>, vector<1x8xf32>
    %45 = vector.broadcast %44 : vector<1x8xf32> to vector<8x8xf32>
    %46 = arith.mulf %43, %45 : vector<8x8xf32>
    %c0_21 = arith.constant 0 : index
    %c0_22 = arith.constant 0 : index
    %47 = vector.load %arg7[%c0_21, %c0_22] : memref<4x8xf32, #tpu.memory_space<vmem>>, vector<1x8xf32>
    %48 = vector.broadcast %47 : vector<1x8xf32> to vector<8x8xf32>
    %49 = arith.addf %46, %48 : vector<8x8xf32>
    %c0_23 = arith.constant 0 : index
    %c0_24 = arith.constant 0 : index
    %50 = vector.load %arg8[%c0_23, %c0_24] : memref<8x32xf32, #tpu.memory_space<vmem>>, vector<8x8xf32>
    tpu.vector_store %arg8[%c0_23, %c0_24], %49 {strides = array<i32>} : memref<8x32xf32, #tpu.memory_space<vmem>>, vector<8x8xf32>,
    %51 = vector.extract_strided_slice %7 {offsets = [0, 1], sizes = [8, 1], strides = [1, 1]} : vector<8x4xf32> to vector<8x1xf32>
    %52 = vector.extract_strided_slice %8 {offsets = [1, 0], sizes = [1, 16], strides = [1, 1]} : vector<4x16xf32> to vector<1x16xf32>
    %53 = vector.broadcast %51 : vector<8x1xf32> to vector<8x16xf32>
    %54 = vector.broadcast %52 : vector<1x16xf32> to vector<8x16xf32>
    %55 = arith.addf %53, %54 : vector<8x16xf32>
    %cst_25 = arith.constant 0.000000e+00 : f32
    %56 = vector.broadcast %cst_25 : f32 to vector<8x16xf32>
    %57 = arith.cmpf ogt, %55, %56 : vector<8x16xf32>
    %cst_26 = arith.constant 2.000000e-01 : f32
    %58 = vector.broadcast %cst_26 : f32 to vector<8x16xf32>
    %59 = arith.mulf %58, %55 : vector<8x16xf32>
    %60 = arith.select %57, %55, %59 : vector<8x16xi1>, vector<8x16xf32>
    %61 = arith.addf %60, %6 : vector<8x16xf32>
    %cst_27 = arith.constant dense<0xFF800000> : vector<8xf32>
    %62 = vector.multi_reduction <maximumf>, %61, %cst_27 [1] : vector<8x16xf32> to vector<8xf32>
    %63 = vector.shape_cast %62 : vector<8xf32> to vector<8x1xf32>
    %cst_28 = arith.constant -1.000000e+04 : f32
    %64 = vector.broadcast %cst_28 : f32 to vector<8x1xf32>
    %65 = arith.maximumf %63, %64 : vector<8x1xf32>
    %66 = vector.broadcast %65 : vector<8x1xf32> to vector<8x16xf32>
    %67 = arith.subf %61, %66 : vector<8x16xf32>
    %68 = arith.truncf %67 : vector<8x16xf32> to vector<8x16xbf16>
    %69 = math.exp %68 : vector<8x16xbf16>
    %70 = arith.extf %69 : vector<8x16xbf16> to vector<8x16xf32>
    %cst_29 = arith.constant dense<0.000000e+00> : vector<8xf32>
    %71 = vector.multi_reduction <add>, %70, %cst_29 [1] : vector<8x16xf32> to vector<8xf32>
    %72 = vector.shape_cast %71 : vector<8xf32> to vector<8x1xf32>
    %cst_30 = arith.constant 1.000000e-30 : f32
    %73 = vector.broadcast %cst_30 : f32 to vector<8x1xf32>
    %74 = arith.maximumf %72, %73 : vector<8x1xf32>
    %75 = tpu.reciprocal %74 {approx = true} : vector<8x1xf32> -> vector<8x1xf32>
    %76 = vector.extract_strided_slice %9 {offsets = [0, 8], sizes = [16, 8], strides = [1, 1]} : vector<16x32xbf16> to vector<16x8xbf16>
    %cst_31 = arith.constant dense<0.000000e+00> : vector<8x8xf32>
    %77 = tpu.matmul %69, %76, %cst_31 {dimension_numbers = #tpu.dot_dimension_numbers<[1], [0], [0], [1], [0, 0, 1, 1], [], []>} : vector<8x16xbf16>, vector<16x8xbf16>, vector<8x8xf32> -> vector<8x8xf32>
    %78 = vector.broadcast %75 : vector<8x1xf32> to vector<8x8xf32>
    %79 = arith.mulf %77, %78 : vector<8x8xf32>
    %c1 = arith.constant 1 : index
    %c0_32 = arith.constant 0 : index
    %80 = vector.load %arg5[%c1, %c0_32] : memref<4x8xf32, #tpu.memory_space<vmem>>, vector<1x8xf32>
    %81 = vector.broadcast %80 : vector<1x8xf32> to vector<8x8xf32>
    %82 = arith.addf %79, %81 : vector<8x8xf32>
    %cst_33 = arith.constant 0.000000e+00 : f32
    %83 = vector.broadcast %cst_33 : f32 to vector<8x8xf32>
    %84 = arith.maximumf %82, %83 : vector<8x8xf32>
    %c1_34 = arith.constant 1 : index
    %c0_35 = arith.constant 0 : index
    %85 = vector.load %arg6[%c1_34, %c0_35] : memref<4x8xf32, #tpu.memory_space<vmem>>, vector<1x8xf32>
    %86 = vector.broadcast %85 : vector<1x8xf32> to vector<8x8xf32>
    %87 = arith.mulf %84, %86 : vector<8x8xf32>
    %c1_36 = arith.constant 1 : index
    %c0_37 = arith.constant 0 : index
    %88 = vector.load %arg7[%c1_36, %c0_37] : memref<4x8xf32, #tpu.memory_space<vmem>>, vector<1x8xf32>
    %89 = vector.broadcast %88 : vector<1x8xf32> to vector<8x8xf32>
    %90 = arith.addf %87, %89 : vector<8x8xf32>
    %c0_38 = arith.constant 0 : index
    %c8 = arith.constant 8 : index
    %91 = vector.load %arg8[%c0_38, %c8] : memref<8x32xf32, #tpu.memory_space<vmem>>, vector<8x8xf32>
    tpu.vector_store %arg8[%c0_38, %c8], %90 {strides = array<i32>} : memref<8x32xf32, #tpu.memory_space<vmem>>, vector<8x8xf32>,
    %92 = vector.extract_strided_slice %7 {offsets = [0, 2], sizes = [8, 1], strides = [1, 1]} : vector<8x4xf32> to vector<8x1xf32>
    %93 = vector.extract_strided_slice %8 {offsets = [2, 0], sizes = [1, 16], strides = [1, 1]} : vector<4x16xf32> to vector<1x16xf32>
    %94 = vector.broadcast %92 : vector<8x1xf32> to vector<8x16xf32>
    %95 = vector.broadcast %93 : vector<1x16xf32> to vector<8x16xf32>
    %96 = arith.addf %94, %95 : vector<8x16xf32>
    %cst_39 = arith.constant 0.000000e+00 : f32
    %97 = vector.broadcast %cst_39 : f32 to vector<8x16xf32>
    %98 = arith.cmpf ogt, %96, %97 : vector<8x16xf32>
    %cst_40 = arith.constant 2.000000e-01 : f32
    %99 = vector.broadcast %cst_40 : f32 to vector<8x16xf32>
    %100 = arith.mulf %99, %96 : vector<8x16xf32>
    %101 = arith.select %98, %96, %100 : vector<8x16xi1>, vector<8x16xf32>
    %102 = arith.addf %101, %6 : vector<8x16xf32>
    %cst_41 = arith.constant dense<0xFF800000> : vector<8xf32>
    %103 = vector.multi_reduction <maximumf>, %102, %cst_41 [1] : vector<8x16xf32> to vector<8xf32>
    %104 = vector.shape_cast %103 : vector<8xf32> to vector<8x1xf32>
    %cst_42 = arith.constant -1.000000e+04 : f32
    %105 = vector.broadcast %cst_42 : f32 to vector<8x1xf32>
    %106 = arith.maximumf %104, %105 : vector<8x1xf32>
    %107 = vector.broadcast %106 : vector<8x1xf32> to vector<8x16xf32>
    %108 = arith.subf %102, %107 : vector<8x16xf32>
    %109 = arith.truncf %108 : vector<8x16xf32> to vector<8x16xbf16>
    %110 = math.exp %109 : vector<8x16xbf16>
    %111 = arith.extf %110 : vector<8x16xbf16> to vector<8x16xf32>
    %cst_43 = arith.constant dense<0.000000e+00> : vector<8xf32>
    %112 = vector.multi_reduction <add>, %111, %cst_43 [1] : vector<8x16xf32> to vector<8xf32>
    %113 = vector.shape_cast %112 : vector<8xf32> to vector<8x1xf32>
    %cst_44 = arith.constant 1.000000e-30 : f32
    %114 = vector.broadcast %cst_44 : f32 to vector<8x1xf32>
    %115 = arith.maximumf %113, %114 : vector<8x1xf32>
    %116 = tpu.reciprocal %115 {approx = true} : vector<8x1xf32> -> vector<8x1xf32>
    %117 = vector.extract_strided_slice %9 {offsets = [0, 16], sizes = [16, 8], strides = [1, 1]} : vector<16x32xbf16> to vector<16x8xbf16>
    %cst_45 = arith.constant dense<0.000000e+00> : vector<8x8xf32>
    %118 = tpu.matmul %110, %117, %cst_45 {dimension_numbers = #tpu.dot_dimension_numbers<[1], [0], [0], [1], [0, 0, 1, 1], [], []>} : vector<8x16xbf16>, vector<16x8xbf16>, vector<8x8xf32> -> vector<8x8xf32>
    %119 = vector.broadcast %116 : vector<8x1xf32> to vector<8x8xf32>
    %120 = arith.mulf %118, %119 : vector<8x8xf32>
    %c2 = arith.constant 2 : index
    %c0_46 = arith.constant 0 : index
    %121 = vector.load %arg5[%c2, %c0_46] : memref<4x8xf32, #tpu.memory_space<vmem>>, vector<1x8xf32>
    %122 = vector.broadcast %121 : vector<1x8xf32> to vector<8x8xf32>
    %123 = arith.addf %120, %122 : vector<8x8xf32>
    %cst_47 = arith.constant 0.000000e+00 : f32
    %124 = vector.broadcast %cst_47 : f32 to vector<8x8xf32>
    %125 = arith.maximumf %123, %124 : vector<8x8xf32>
    %c2_48 = arith.constant 2 : index
    %c0_49 = arith.constant 0 : index
    %126 = vector.load %arg6[%c2_48, %c0_49] : memref<4x8xf32, #tpu.memory_space<vmem>>, vector<1x8xf32>
    %127 = vector.broadcast %126 : vector<1x8xf32> to vector<8x8xf32>
    %128 = arith.mulf %125, %127 : vector<8x8xf32>
    %c2_50 = arith.constant 2 : index
    %c0_51 = arith.constant 0 : index
    %129 = vector.load %arg7[%c2_50, %c0_51] : memref<4x8xf32, #tpu.memory_space<vmem>>, vector<1x8xf32>
    %130 = vector.broadcast %129 : vector<1x8xf32> to vector<8x8xf32>
    %131 = arith.addf %128, %130 : vector<8x8xf32>
    %c0_52 = arith.constant 0 : index
    %c16 = arith.constant 16 : index
    %132 = vector.load %arg8[%c0_52, %c16] : memref<8x32xf32, #tpu.memory_space<vmem>>, vector<8x8xf32>
    tpu.vector_store %arg8[%c0_52, %c16], %131 {strides = array<i32>} : memref<8x32xf32, #tpu.memory_space<vmem>>, vector<8x8xf32>,
    %133 = vector.extract_strided_slice %7 {offsets = [0, 3], sizes = [8, 1], strides = [1, 1]} : vector<8x4xf32> to vector<8x1xf32>
    %134 = vector.extract_strided_slice %8 {offsets = [3, 0], sizes = [1, 16], strides = [1, 1]} : vector<4x16xf32> to vector<1x16xf32>
    %135 = vector.broadcast %133 : vector<8x1xf32> to vector<8x16xf32>
    %136 = vector.broadcast %134 : vector<1x16xf32> to vector<8x16xf32>
    %137 = arith.addf %135, %136 : vector<8x16xf32>
    %cst_53 = arith.constant 0.000000e+00 : f32
    %138 = vector.broadcast %cst_53 : f32 to vector<8x16xf32>
    %139 = arith.cmpf ogt, %137, %138 : vector<8x16xf32>
    %cst_54 = arith.constant 2.000000e-01 : f32
    %140 = vector.broadcast %cst_54 : f32 to vector<8x16xf32>
    %141 = arith.mulf %140, %137 : vector<8x16xf32>
    %142 = arith.select %139, %137, %141 : vector<8x16xi1>, vector<8x16xf32>
    %143 = arith.addf %142, %6 : vector<8x16xf32>
    %cst_55 = arith.constant dense<0xFF800000> : vector<8xf32>
    %144 = vector.multi_reduction <maximumf>, %143, %cst_55 [1] : vector<8x16xf32> to vector<8xf32>
    %145 = vector.shape_cast %144 : vector<8xf32> to vector<8x1xf32>
    %cst_56 = arith.constant -1.000000e+04 : f32
    %146 = vector.broadcast %cst_56 : f32 to vector<8x1xf32>
    %147 = arith.maximumf %145, %146 : vector<8x1xf32>
    %148 = vector.broadcast %147 : vector<8x1xf32> to vector<8x16xf32>
    %149 = arith.subf %143, %148 : vector<8x16xf32>
    %150 = arith.truncf %149 : vector<8x16xf32> to vector<8x16xbf16>
    %151 = math.exp %150 : vector<8x16xbf16>
    %152 = arith.extf %151 : vector<8x16xbf16> to vector<8x16xf32>
    %cst_57 = arith.constant dense<0.000000e+00> : vector<8xf32>
    %153 = vector.multi_reduction <add>, %152, %cst_57 [1] : vector<8x16xf32> to vector<8xf32>
    %154 = vector.shape_cast %153 : vector<8xf32> to vector<8x1xf32>
    %cst_58 = arith.constant 1.000000e-30 : f32
    %155 = vector.broadcast %cst_58 : f32 to vector<8x1xf32>
    %156 = arith.maximumf %154, %155 : vector<8x1xf32>
    %157 = tpu.reciprocal %156 {approx = true} : vector<8x1xf32> -> vector<8x1xf32>
    %158 = vector.extract_strided_slice %9 {offsets = [0, 24], sizes = [16, 8], strides = [1, 1]} : vector<16x32xbf16> to vector<16x8xbf16>
    %cst_59 = arith.constant dense<0.000000e+00> : vector<8x8xf32>
    %159 = tpu.matmul %151, %158, %cst_59 {dimension_numbers = #tpu.dot_dimension_numbers<[1], [0], [0], [1], [0, 0, 1, 1], [], []>} : vector<8x16xbf16>, vector<16x8xbf16>, vector<8x8xf32> -> vector<8x8xf32>
    %160 = vector.broadcast %157 : vector<8x1xf32> to vector<8x8xf32>
    %161 = arith.mulf %159, %160 : vector<8x8xf32>
    %c3 = arith.constant 3 : index
    %c0_60 = arith.constant 0 : index
    %162 = vector.load %arg5[%c3, %c0_60] : memref<4x8xf32, #tpu.memory_space<vmem>>, vector<1x8xf32>
    %163 = vector.broadcast %162 : vector<1x8xf32> to vector<8x8xf32>
    %164 = arith.addf %161, %163 : vector<8x8xf32>
    %cst_61 = arith.constant 0.000000e+00 : f32
    %165 = vector.broadcast %cst_61 : f32 to vector<8x8xf32>
    %166 = arith.maximumf %164, %165 : vector<8x8xf32>
    %c3_62 = arith.constant 3 : index
    %c0_63 = arith.constant 0 : index
    %167 = vector.load %arg6[%c3_62, %c0_63] : memref<4x8xf32, #tpu.memory_space<vmem>>, vector<1x8xf32>
    %168 = vector.broadcast %167 : vector<1x8xf32> to vector<8x8xf32>
    %169 = arith.mulf %166, %168 : vector<8x8xf32>
    %c3_64 = arith.constant 3 : index
    %c0_65 = arith.constant 0 : index
    %170 = vector.load %arg7[%c3_64, %c0_65] : memref<4x8xf32, #tpu.memory_space<vmem>>, vector<1x8xf32>
    %171 = vector.broadcast %170 : vector<1x8xf32> to vector<8x8xf32>
    %172 = arith.addf %169, %171 : vector<8x8xf32>
    %c0_66 = arith.constant 0 : index
    %c24 = arith.constant 24 : index
    %173 = vector.load %arg8[%c0_66, %c24] : memref<8x32xf32, #tpu.memory_space<vmem>>, vector<8x8xf32>
    tpu.vector_store %arg8[%c0_66, %c24], %172 {strides = array<i32>} : memref<8x32xf32, #tpu.memory_space<vmem>>, vector<8x8xf32>,
    return
  }
  func.func @transform_0(%arg0: i32) -> (i32, i32) {
    %c0_i32 = arith.constant 0 : i32
    %c0_i32_0 = arith.constant 0 : i32
    return %arg0, %c0_i32 : i32, i32
  }
  func.func @transform_1(%arg0: i32) -> (i32, i32) {
    %c0_i32 = arith.constant 0 : i32
    %c0_i32_0 = arith.constant 0 : i32
    return %arg0, %c0_i32 : i32, i32
  }
  func.func @transform_2(%arg0: i32) -> (i32, i32) {
    %c0_i32 = arith.constant 0 : i32
    %c0_i32_0 = arith.constant 0 : i32
    %c0_i32_1 = arith.constant 0 : i32
    return %c0_i32, %c0_i32_0 : i32, i32
  }
  func.func @transform_3(%arg0: i32) -> (i32, i32) {
    %c0_i32 = arith.constant 0 : i32
    %c0_i32_0 = arith.constant 0 : i32
    %c0_i32_1 = arith.constant 0 : i32
    return %c0_i32, %c0_i32_0 : i32, i32
  }
  func.func @transform_4(%arg0: i32) -> (i32, i32) {
    %c0_i32 = arith.constant 0 : i32
    %c0_i32_0 = arith.constant 0 : i32
    %c0_i32_1 = arith.constant 0 : i32
    return %c0_i32, %c0_i32_0 : i32, i32
  }
  func.func @transform_5(%arg0: i32) -> (i32, i32) {
    %c0_i32 = arith.constant 0 : i32
    %c0_i32_0 = arith.constant 0 : i32
    %c0_i32_1 = arith.constant 0 : i32
    return %c0_i32, %c0_i32_0 : i32, i32
  }
  func.func @transform_6(%arg0: i32) -> (i32, i32) {
    %c0_i32 = arith.constant 0 : i32
    %c0_i32_0 = arith.constant 0 : i32
    %c0_i32_1 = arith.constant 0 : i32
    return %c0_i32, %c0_i32_0 : i32, i32
  }
  func.func @transform_7(%arg0: i32) -> (i32, i32) {
    %c0_i32 = arith.constant 0 : i32
    %c0_i32_0 = arith.constant 0 : i32
    return %arg0, %c0_i32 : i32, i32
  }
}

module attributes {stable_mosaic.version = 11 : i64} {
  func.func @gat_project_kernel(%arg0: i32, %arg1: memref<16x32xbf16, #tpu.memory_space<vmem>>, %arg2: memref<32x40xbf16, #tpu.memory_space<vmem>>, %arg3: memref<16x32xbf16, #tpu.memory_space<vmem>>, %arg4: memref<16x8xf32, #tpu.memory_space<vmem>>) attributes {dimension_semantics = [#tpu.dimension_semantics<parallel>], iteration_bounds = array<i64: 1>, scalar_prefetch = 0 : i64, scratch_operands = 0 : i64, tpu.core_type = #tpu.core_type<tc>, window_params = [{transform_indices = @transform_0, window_bounds = array<i64: 16, 32>}, {pipeline_mode = #tpu.pipeline_mode<synchronous>, transform_indices = @transform_1, window_bounds = array<i64: 32, 40>}, {transform_indices = @transform_2, window_bounds = array<i64: 16, 32>}, {transform_indices = @transform_3, window_bounds = array<i64: 16, 8>}]} {
    %c0 = arith.constant 0 : index
    %c0_0 = arith.constant 0 : index
    %0 = vector.load %arg1[%c0, %c0_0] : memref<16x32xbf16, #tpu.memory_space<vmem>>, vector<16x32xbf16>
    %c0_1 = arith.constant 0 : index
    %c0_2 = arith.constant 0 : index
    %1 = vector.load %arg2[%c0_1, %c0_2] : memref<32x40xbf16, #tpu.memory_space<vmem>>, vector<32x40xbf16>
    %cst = arith.constant dense<0.000000e+00> : vector<16x40xf32>
    %2 = tpu.matmul %0, %1, %cst {dimension_numbers = #tpu.dot_dimension_numbers<[1], [0], [0], [1], [0, 0, 1, 1], [], []>} : vector<16x32xbf16>, vector<32x40xbf16>, vector<16x40xf32> -> vector<16x40xf32>
    %3 = vector.extract_strided_slice %2 {offsets = [0, 0], sizes = [16, 32], strides = [1, 1]} : vector<16x40xf32> to vector<16x32xf32>
    %4 = arith.truncf %3 : vector<16x32xf32> to vector<16x32xbf16>
    %c0_3 = arith.constant 0 : index
    %c0_4 = arith.constant 0 : index
    %5 = vector.load %arg3[%c0_3, %c0_4] : memref<16x32xbf16, #tpu.memory_space<vmem>>, vector<16x32xbf16>
    tpu.vector_store %arg3[%c0_3, %c0_4], %4 {strides = array<i32>} : memref<16x32xbf16, #tpu.memory_space<vmem>>, vector<16x32xbf16>,
    %6 = vector.extract_strided_slice %2 {offsets = [0, 32], sizes = [16, 8], strides = [1, 1]} : vector<16x40xf32> to vector<16x8xf32>
    %c0_5 = arith.constant 0 : index
    %c0_6 = arith.constant 0 : index
    %7 = vector.load %arg4[%c0_5, %c0_6] : memref<16x8xf32, #tpu.memory_space<vmem>>, vector<16x8xf32>
    tpu.vector_store %arg4[%c0_5, %c0_6], %6 {strides = array<i32>} : memref<16x8xf32, #tpu.memory_space<vmem>>, vector<16x8xf32>,
    return
  }
  func.func @transform_0(%arg0: i32) -> (i32, i32) {
    %c0_i32 = arith.constant 0 : i32
    %c0_i32_0 = arith.constant 0 : i32
    return %arg0, %c0_i32 : i32, i32
  }
  func.func @transform_1(%arg0: i32) -> (i32, i32) {
    %c0_i32 = arith.constant 0 : i32
    %c0_i32_0 = arith.constant 0 : i32
    %c0_i32_1 = arith.constant 0 : i32
    return %c0_i32, %c0_i32_0 : i32, i32
  }
  func.func @transform_2(%arg0: i32) -> (i32, i32) {
    %c0_i32 = arith.constant 0 : i32
    %c0_i32_0 = arith.constant 0 : i32
    return %arg0, %c0_i32 : i32, i32
  }
  func.func @transform_3(%arg0: i32) -> (i32, i32) {
    %c0_i32 = arith.constant 0 : i32
    %c0_i32_0 = arith.constant 0 : i32
    return %arg0, %c0_i32 : i32, i32
  }
}

module attributes {stable_mosaic.version = 11 : i64} {
  func.func @gat_project_kernel(%arg0: i32, %arg1: memref<16x32xbf16, #tpu.memory_space<vmem>>, %arg2: memref<32x10xbf16, #tpu.memory_space<vmem>>, %arg3: memref<16x8xbf16, #tpu.memory_space<vmem>>, %arg4: memref<16x2xf32, #tpu.memory_space<vmem>>) attributes {dimension_semantics = [#tpu.dimension_semantics<parallel>], iteration_bounds = array<i64: 1>, scalar_prefetch = 0 : i64, scratch_operands = 0 : i64, tpu.core_type = #tpu.core_type<tc>, window_params = [{transform_indices = @transform_0, window_bounds = array<i64: 16, 32>}, {pipeline_mode = #tpu.pipeline_mode<synchronous>, transform_indices = @transform_1, window_bounds = array<i64: 32, 10>}, {transform_indices = @transform_2, window_bounds = array<i64: 16, 8>}, {transform_indices = @transform_3, window_bounds = array<i64: 16, 2>}]} {
    %c0 = arith.constant 0 : index
    %c0_0 = arith.constant 0 : index
    %0 = vector.load %arg1[%c0, %c0_0] : memref<16x32xbf16, #tpu.memory_space<vmem>>, vector<16x32xbf16>
    %c0_1 = arith.constant 0 : index
    %c0_2 = arith.constant 0 : index
    %1 = vector.load %arg2[%c0_1, %c0_2] : memref<32x10xbf16, #tpu.memory_space<vmem>>, vector<32x10xbf16>
    %cst = arith.constant dense<0.000000e+00> : vector<16x10xf32>
    %2 = tpu.matmul %0, %1, %cst {dimension_numbers = #tpu.dot_dimension_numbers<[1], [0], [0], [1], [0, 0, 1, 1], [], []>} : vector<16x32xbf16>, vector<32x10xbf16>, vector<16x10xf32> -> vector<16x10xf32>
    %3 = vector.extract_strided_slice %2 {offsets = [0, 0], sizes = [16, 8], strides = [1, 1]} : vector<16x10xf32> to vector<16x8xf32>
    %4 = arith.truncf %3 : vector<16x8xf32> to vector<16x8xbf16>
    %c0_3 = arith.constant 0 : index
    %c0_4 = arith.constant 0 : index
    %5 = vector.load %arg3[%c0_3, %c0_4] : memref<16x8xbf16, #tpu.memory_space<vmem>>, vector<16x8xbf16>
    tpu.vector_store %arg3[%c0_3, %c0_4], %4 {strides = array<i32>} : memref<16x8xbf16, #tpu.memory_space<vmem>>, vector<16x8xbf16>,
    %6 = vector.extract_strided_slice %2 {offsets = [0, 8], sizes = [16, 2], strides = [1, 1]} : vector<16x10xf32> to vector<16x2xf32>
    %c0_5 = arith.constant 0 : index
    %c0_6 = arith.constant 0 : index
    %7 = vector.load %arg4[%c0_5, %c0_6] : memref<16x2xf32, #tpu.memory_space<vmem>>, vector<16x2xf32>
    tpu.vector_store %arg4[%c0_5, %c0_6], %6 {strides = array<i32>} : memref<16x2xf32, #tpu.memory_space<vmem>>, vector<16x2xf32>,
    return
  }
  func.func @transform_0(%arg0: i32) -> (i32, i32) {
    %c0_i32 = arith.constant 0 : i32
    %c0_i32_0 = arith.constant 0 : i32
    return %arg0, %c0_i32 : i32, i32
  }
  func.func @transform_1(%arg0: i32) -> (i32, i32) {
    %c0_i32 = arith.constant 0 : i32
    %c0_i32_0 = arith.constant 0 : i32
    %c0_i32_1 = arith.constant 0 : i32
    return %c0_i32, %c0_i32_0 : i32, i32
  }
  func.func @transform_2(%arg0: i32) -> (i32, i32) {
    %c0_i32 = arith.constant 0 : i32
    %c0_i32_0 = arith.constant 0 : i32
    return %arg0, %c0_i32 : i32, i32
  }
  func.func @transform_3(%arg0: i32) -> (i32, i32) {
    %c0_i32 = arith.constant 0 : i32
    %c0_i32_0 = arith.constant 0 : i32
    return %arg0, %c0_i32 : i32, i32
  }
}

module attributes {stable_mosaic.version = 11 : i64} {
  func.func @gat_attn_kernel(%arg0: i32, %arg1: memref<8x16xi8, #tpu.memory_space<vmem>>, %arg2: memref<8x1xf32, #tpu.memory_space<vmem>>, %arg3: memref<1x16xf32, #tpu.memory_space<vmem>>, %arg4: memref<16x8xbf16, #tpu.memory_space<vmem>>, %arg5: memref<1x8xf32, #tpu.memory_space<vmem>>, %arg6: memref<1x8xf32, #tpu.memory_space<vmem>>, %arg7: memref<1x8xf32, #tpu.memory_space<vmem>>, %arg8: memref<8x8xf32, #tpu.memory_space<vmem>>) attributes {dimension_semantics = [#tpu.dimension_semantics<parallel>], iteration_bounds = array<i64: 2>, scalar_prefetch = 0 : i64, scratch_operands = 0 : i64, tpu.core_type = #tpu.core_type<tc>, window_params = [{transform_indices = @transform_0, window_bounds = array<i64: 8, 16>}, {transform_indices = @transform_1, window_bounds = array<i64: 8, 1>}, {pipeline_mode = #tpu.pipeline_mode<synchronous>, transform_indices = @transform_2, window_bounds = array<i64: 1, 16>}, {pipeline_mode = #tpu.pipeline_mode<synchronous>, transform_indices = @transform_3, window_bounds = array<i64: 16, 8>}, {pipeline_mode = #tpu.pipeline_mode<synchronous>, transform_indices = @transform_4, window_bounds = array<i64: 1, 8>}, {pipeline_mode = #tpu.pipeline_mode<synchronous>, transform_indices = @transform_5, window_bounds = array<i64: 1, 8>}, {pipeline_mode = #tpu.pipeline_mode<synchronous>, transform_indices = @transform_6, window_bounds = array<i64: 1, 8>}, {transform_indices = @transform_7, window_bounds = array<i64: 8, 8>}]} {
    %c0 = arith.constant 0 : index
    %c0_0 = arith.constant 0 : index
    %0 = vector.load %arg1[%c0, %c0_0] : memref<8x16xi8, #tpu.memory_space<vmem>>, vector<8x16xi8>
    %1 = arith.sitofp %0 : vector<8x16xi8> to vector<8x16xf32>
    %cst = arith.constant 5.000000e-01 : f32
    %2 = vector.broadcast %cst : f32 to vector<8x16xf32>
    %3 = arith.cmpf ogt, %1, %2 : vector<8x16xf32>
    %cst_1 = arith.constant 0.000000e+00 : f32
    %cst_2 = arith.constant -1.000000e+30 : f32
    %4 = vector.broadcast %cst_1 : f32 to vector<8x16xf32>
    %5 = vector.broadcast %cst_2 : f32 to vector<8x16xf32>
    %6 = arith.select %3, %4, %5 : vector<8x16xi1>, vector<8x16xf32>
    %c0_3 = arith.constant 0 : index
    %c0_4 = arith.constant 0 : index
    %7 = vector.load %arg2[%c0_3, %c0_4] : memref<8x1xf32, #tpu.memory_space<vmem>>, vector<8x1xf32>
    %c0_5 = arith.constant 0 : index
    %c0_6 = arith.constant 0 : index
    %8 = vector.load %arg3[%c0_5, %c0_6] : memref<1x16xf32, #tpu.memory_space<vmem>>, vector<1x16xf32>
    %c0_7 = arith.constant 0 : index
    %c0_8 = arith.constant 0 : index
    %9 = vector.load %arg4[%c0_7, %c0_8] : memref<16x8xbf16, #tpu.memory_space<vmem>>, vector<16x8xbf16>
    %10 = vector.broadcast %7 : vector<8x1xf32> to vector<8x16xf32>
    %11 = vector.broadcast %8 : vector<1x16xf32> to vector<8x16xf32>
    %12 = arith.addf %10, %11 : vector<8x16xf32>
    %cst_9 = arith.constant 0.000000e+00 : f32
    %13 = vector.broadcast %cst_9 : f32 to vector<8x16xf32>
    %14 = arith.cmpf ogt, %12, %13 : vector<8x16xf32>
    %cst_10 = arith.constant 2.000000e-01 : f32
    %15 = vector.broadcast %cst_10 : f32 to vector<8x16xf32>
    %16 = arith.mulf %15, %12 : vector<8x16xf32>
    %17 = arith.select %14, %12, %16 : vector<8x16xi1>, vector<8x16xf32>
    %18 = arith.addf %17, %6 : vector<8x16xf32>
    %cst_11 = arith.constant dense<0xFF800000> : vector<8xf32>
    %19 = vector.multi_reduction <maximumf>, %18, %cst_11 [1] : vector<8x16xf32> to vector<8xf32>
    %20 = vector.shape_cast %19 : vector<8xf32> to vector<8x1xf32>
    %cst_12 = arith.constant -1.000000e+04 : f32
    %21 = vector.broadcast %cst_12 : f32 to vector<8x1xf32>
    %22 = arith.maximumf %20, %21 : vector<8x1xf32>
    %23 = vector.broadcast %22 : vector<8x1xf32> to vector<8x16xf32>
    %24 = arith.subf %18, %23 : vector<8x16xf32>
    %25 = arith.truncf %24 : vector<8x16xf32> to vector<8x16xbf16>
    %26 = math.exp %25 : vector<8x16xbf16>
    %27 = arith.extf %26 : vector<8x16xbf16> to vector<8x16xf32>
    %cst_13 = arith.constant dense<0.000000e+00> : vector<8xf32>
    %28 = vector.multi_reduction <add>, %27, %cst_13 [1] : vector<8x16xf32> to vector<8xf32>
    %29 = vector.shape_cast %28 : vector<8xf32> to vector<8x1xf32>
    %cst_14 = arith.constant 1.000000e-30 : f32
    %30 = vector.broadcast %cst_14 : f32 to vector<8x1xf32>
    %31 = arith.maximumf %29, %30 : vector<8x1xf32>
    %32 = tpu.reciprocal %31 {approx = true} : vector<8x1xf32> -> vector<8x1xf32>
    %cst_15 = arith.constant dense<0.000000e+00> : vector<8x8xf32>
    %33 = tpu.matmul %26, %9, %cst_15 {dimension_numbers = #tpu.dot_dimension_numbers<[1], [0], [0], [1], [0, 0, 1, 1], [], []>} : vector<8x16xbf16>, vector<16x8xbf16>, vector<8x8xf32> -> vector<8x8xf32>
    %34 = vector.broadcast %32 : vector<8x1xf32> to vector<8x8xf32>
    %35 = arith.mulf %33, %34 : vector<8x8xf32>
    %c0_16 = arith.constant 0 : index
    %c0_17 = arith.constant 0 : index
    %36 = vector.load %arg5[%c0_16, %c0_17] : memref<1x8xf32, #tpu.memory_space<vmem>>, vector<1x8xf32>
    %37 = vector.broadcast %36 : vector<1x8xf32> to vector<8x8xf32>
    %38 = arith.addf %35, %37 : vector<8x8xf32>
    %cst_18 = arith.constant 0.000000e+00 : f32
    %39 = vector.broadcast %cst_18 : f32 to vector<8x8xf32>
    %40 = arith.maximumf %38, %39 : vector<8x8xf32>
    %c0_19 = arith.constant 0 : index
    %c0_20 = arith.constant 0 : index
    %41 = vector.load %arg6[%c0_19, %c0_20] : memref<1x8xf32, #tpu.memory_space<vmem>>, vector<1x8xf32>
    %42 = vector.broadcast %41 : vector<1x8xf32> to vector<8x8xf32>
    %43 = arith.mulf %40, %42 : vector<8x8xf32>
    %c0_21 = arith.constant 0 : index
    %c0_22 = arith.constant 0 : index
    %44 = vector.load %arg7[%c0_21, %c0_22] : memref<1x8xf32, #tpu.memory_space<vmem>>, vector<1x8xf32>
    %45 = vector.broadcast %44 : vector<1x8xf32> to vector<8x8xf32>
    %46 = arith.addf %43, %45 : vector<8x8xf32>
    %c0_23 = arith.constant 0 : index
    %c0_24 = arith.constant 0 : index
    %47 = vector.load %arg8[%c0_23, %c0_24] : memref<8x8xf32, #tpu.memory_space<vmem>>, vector<8x8xf32>
    tpu.vector_store %arg8[%c0_23, %c0_24], %46 {strides = array<i32>} : memref<8x8xf32, #tpu.memory_space<vmem>>, vector<8x8xf32>,
    return
  }
  func.func @transform_0(%arg0: i32) -> (i32, i32) {
    %c0_i32 = arith.constant 0 : i32
    %c0_i32_0 = arith.constant 0 : i32
    return %arg0, %c0_i32 : i32, i32
  }
  func.func @transform_1(%arg0: i32) -> (i32, i32) {
    %c0_i32 = arith.constant 0 : i32
    %c0_i32_0 = arith.constant 0 : i32
    return %arg0, %c0_i32 : i32, i32
  }
  func.func @transform_2(%arg0: i32) -> (i32, i32) {
    %c0_i32 = arith.constant 0 : i32
    %c0_i32_0 = arith.constant 0 : i32
    %c0_i32_1 = arith.constant 0 : i32
    return %c0_i32, %c0_i32_0 : i32, i32
  }
  func.func @transform_3(%arg0: i32) -> (i32, i32) {
    %c0_i32 = arith.constant 0 : i32
    %c0_i32_0 = arith.constant 0 : i32
    %c0_i32_1 = arith.constant 0 : i32
    return %c0_i32, %c0_i32_0 : i32, i32
  }
  func.func @transform_4(%arg0: i32) -> (i32, i32) {
    %c0_i32 = arith.constant 0 : i32
    %c0_i32_0 = arith.constant 0 : i32
    %c0_i32_1 = arith.constant 0 : i32
    return %c0_i32, %c0_i32_0 : i32, i32
  }
  func.func @transform_5(%arg0: i32) -> (i32, i32) {
    %c0_i32 = arith.constant 0 : i32
    %c0_i32_0 = arith.constant 0 : i32
    %c0_i32_1 = arith.constant 0 : i32
    return %c0_i32, %c0_i32_0 : i32, i32
  }
  func.func @transform_6(%arg0: i32) -> (i32, i32) {
    %c0_i32 = arith.constant 0 : i32
    %c0_i32_0 = arith.constant 0 : i32
    %c0_i32_1 = arith.constant 0 : i32
    return %c0_i32, %c0_i32_0 : i32, i32
  }
  func.func @transform_7(%arg0: i32) -> (i32, i32) {
    %c0_i32 = arith.constant 0 : i32
    %c0_i32_0 = arith.constant 0 : i32
    return %arg0, %c0_i32 : i32, i32
  }
}

module attributes {stable_mosaic.version = 11 : i64} {
  func.func @pool_fc_kernel(%arg0: i32, %arg1: memref<2x16xbf16, #tpu.memory_space<vmem>>, %arg2: memref<16x8xbf16, #tpu.memory_space<vmem>>, %arg3: memref<8x3xbf16, #tpu.memory_space<vmem>>, %arg4: memref<1x3xf32, #tpu.memory_space<vmem>>, %arg5: memref<2x3xf32, #tpu.memory_space<vmem>>, %arg6: memref<2x8xf32, #tpu.memory_space<vmem>>) attributes {dimension_semantics = [#tpu.dimension_semantics<arbitrary>], iteration_bounds = array<i64: 1>, scalar_prefetch = 0 : i64, scratch_operands = 1 : i64, tpu.core_type = #tpu.core_type<tc>, window_params = [{transform_indices = @transform_0, window_bounds = array<i64: 2, 16>}, {transform_indices = @transform_1, window_bounds = array<i64: 16, 8>}, {pipeline_mode = #tpu.pipeline_mode<synchronous>, transform_indices = @transform_2, window_bounds = array<i64: 8, 3>}, {pipeline_mode = #tpu.pipeline_mode<synchronous>, transform_indices = @transform_3, window_bounds = array<i64: 1, 3>}, {pipeline_mode = #tpu.pipeline_mode<synchronous>, transform_indices = @transform_4, window_bounds = array<i64: 2, 3>}]} {
    %c0_i32 = arith.constant 0 : i32
    %0 = arith.cmpi eq, %arg0, %c0_i32 : i32
    %1 = arith.extui %0 : i1 to i32
    %c0_i32_0 = arith.constant 0 : i32
    %2 = arith.cmpi ne, %1, %c0_i32_0 : i32
    scf.if %2 {
      %cst_10 = arith.constant 0.000000e+00 : f32
      %12 = vector.broadcast %cst_10 : f32 to vector<2x8xf32>
      %c0_11 = arith.constant 0 : index
      %c0_12 = arith.constant 0 : index
      %13 = vector.load %arg6[%c0_11, %c0_12] : memref<2x8xf32, #tpu.memory_space<vmem>>, vector<2x8xf32>
      tpu.vector_store %arg6[%c0_11, %c0_12], %12 {strides = array<i32>} : memref<2x8xf32, #tpu.memory_space<vmem>>, vector<2x8xf32>,
    } else {
    }
    %c0 = arith.constant 0 : index
    %c0_1 = arith.constant 0 : index
    %3 = vector.load %arg6[%c0, %c0_1] : memref<2x8xf32, #tpu.memory_space<vmem>>, vector<2x8xf32>
    %c0_2 = arith.constant 0 : index
    %c0_3 = arith.constant 0 : index
    %4 = vector.load %arg1[%c0_2, %c0_3] : memref<2x16xbf16, #tpu.memory_space<vmem>>, vector<2x16xbf16>
    %c0_4 = arith.constant 0 : index
    %c0_5 = arith.constant 0 : index
    %5 = vector.load %arg2[%c0_4, %c0_5] : memref<16x8xbf16, #tpu.memory_space<vmem>>, vector<16x8xbf16>
    %cst = arith.constant dense<0.000000e+00> : vector<2x8xf32>
    %6 = tpu.matmul %4, %5, %cst {dimension_numbers = #tpu.dot_dimension_numbers<[1], [0], [0], [1], [0, 0, 1, 1], [], []>} : vector<2x16xbf16>, vector<16x8xbf16>, vector<2x8xf32> -> vector<2x8xf32>
    %7 = arith.addf %3, %6 : vector<2x8xf32>
    %c0_6 = arith.constant 0 : index
    %c0_7 = arith.constant 0 : index
    %8 = vector.load %arg6[%c0_6, %c0_7] : memref<2x8xf32, #tpu.memory_space<vmem>>, vector<2x8xf32>
    tpu.vector_store %arg6[%c0_6, %c0_7], %7 {strides = array<i32>} : memref<2x8xf32, #tpu.memory_space<vmem>>, vector<2x8xf32>,
    %c0_i32_8 = arith.constant 0 : i32
    %9 = arith.cmpi eq, %arg0, %c0_i32_8 : i32
    %10 = arith.extui %9 : i1 to i32
    %c0_i32_9 = arith.constant 0 : i32
    %11 = arith.cmpi ne, %10, %c0_i32_9 : i32
    scf.if %11 {
      %c0_10 = arith.constant 0 : index
      %c0_11 = arith.constant 0 : index
      %12 = vector.load %arg6[%c0_10, %c0_11] : memref<2x8xf32, #tpu.memory_space<vmem>>, vector<2x8xf32>
      %13 = arith.truncf %12 : vector<2x8xf32> to vector<2x8xbf16>
      %c0_12 = arith.constant 0 : index
      %c0_13 = arith.constant 0 : index
      %14 = vector.load %arg3[%c0_12, %c0_13] : memref<8x3xbf16, #tpu.memory_space<vmem>>, vector<8x3xbf16>
      %cst_14 = arith.constant dense<0.000000e+00> : vector<2x3xf32>
      %15 = tpu.matmul %13, %14, %cst_14 {dimension_numbers = #tpu.dot_dimension_numbers<[1], [0], [0], [1], [0, 0, 1, 1], [], []>} : vector<2x8xbf16>, vector<8x3xbf16>, vector<2x3xf32> -> vector<2x3xf32>
      %c0_15 = arith.constant 0 : index
      %c0_16 = arith.constant 0 : index
      %16 = vector.load %arg4[%c0_15, %c0_16] : memref<1x3xf32, #tpu.memory_space<vmem>>, vector<1x3xf32>
      %17 = vector.broadcast %16 : vector<1x3xf32> to vector<2x3xf32>
      %18 = arith.addf %15, %17 : vector<2x3xf32>
      %c0_17 = arith.constant 0 : index
      %c0_18 = arith.constant 0 : index
      %19 = vector.load %arg5[%c0_17, %c0_18] : memref<2x3xf32, #tpu.memory_space<vmem>>, vector<2x3xf32>
      tpu.vector_store %arg5[%c0_17, %c0_18], %18 {strides = array<i32>} : memref<2x3xf32, #tpu.memory_space<vmem>>, vector<2x3xf32>,
    } else {
    }
    return
  }
  func.func @transform_0(%arg0: i32) -> (i32, i32) {
    %c0_i32 = arith.constant 0 : i32
    %c0_i32_0 = arith.constant 0 : i32
    return %c0_i32, %arg0 : i32, i32
  }
  func.func @transform_1(%arg0: i32) -> (i32, i32) {
    %c0_i32 = arith.constant 0 : i32
    %c0_i32_0 = arith.constant 0 : i32
    return %arg0, %c0_i32 : i32, i32
  }
  func.func @transform_2(%arg0: i32) -> (i32, i32) {
    %c0_i32 = arith.constant 0 : i32
    %c0_i32_0 = arith.constant 0 : i32
    %c0_i32_1 = arith.constant 0 : i32
    return %c0_i32, %c0_i32_0 : i32, i32
  }
  func.func @transform_3(%arg0: i32) -> (i32, i32) {
    %c0_i32 = arith.constant 0 : i32
    %c0_i32_0 = arith.constant 0 : i32
    %c0_i32_1 = arith.constant 0 : i32
    return %c0_i32, %c0_i32_0 : i32, i32
  }
  func.func @transform_4(%arg0: i32) -> (i32, i32) {
    %c0_i32 = arith.constant 0 : i32
    %c0_i32_0 = arith.constant 0 : i32
    %c0_i32_1 = arith.constant 0 : i32
    return %c0_i32, %c0_i32_0 : i32, i32
  }
}

</mosaic_0001>

<bundles_post_ra>
// kernel: gat_forward.7
= control target key start
LH: loop header
LB: loop body
LE: loop exit
PB: predicated region body
PF: predicated region fallthrough
CT: control target
= control target key end

     0   :  { %vm26_vm0 = vcmask 1041408   ;;  %vm22_vm1 = vcmask 31744   ;;  %vm46_vm2 = vcmask 257024   ;;  %s75_s16 = smov 96   ;;  %vm57_vm3 = vcmask 64512   ;;  %s114_s1 = inlined_call_operand.vmem [shape: bf16[4,40], index: 1, kind: input, shape index: {}]   ;;  %s115_s0 = inlined_call_operand.vmem [shape: bf16[16,4], index: 0, kind: input, shape index: {}]   ;;  %s116_s2 = inlined_call_operand.vmem [shape: bf16[16,32], index: 2, kind: output, shape index: {0}]   ;;  %s117_s3 = inlined_call_operand.vmem [shape: f32[16,8], index: 3, kind: output, shape index: {1}]  }
   0x1   :  { %v16_v0 = vld [vmem:[%s114_s1] sm:$0x3] }
   0x2   :  { %v28_v1 = vsel %vm26_vm0, %v16_v0, 0  ;;  %v73_v2 = vld [vmem:[%s115_s0] sm:$0xff] }
   0x3   :  { %37 = vmatpush.bf16.msra.mxu0 %v28_v1 }
   0x6   :  { %72 = vmatmul.msk.bf16.vlgmr.msra.gmra.mxu0 %vm22_vm1, %v73_v2 }
  0x83   :  { %v39_v3 = vpop.f32.mrf.mxu0 }
  0x84   :  { %v44_v4 = vpack.c.bf16 %v39_v3, %v39_v3  ;;  %51 = vrot.lane.b32.xlu0 %v39_v3, %s75_s16 }
  0x86   :  { %47 = vst.msk [vmem:[%s116_s2] sm:$0xf] %vm46_vm2, %v44_v4 }
  0x8b   :  { %v41_v5 = vpop.f32.mrf.mxu0 }
  0x8c   :  { %v45_v6 = vpack.c.bf16 %v41_v5, %v41_v5  ;;  %53 = vrot.lane.b32.xlu0 %v41_v5, %s75_s16 }
  0x8e   :  { %48 = vst.msk [vmem:[%s116_s2 + $0x4] sm:$0xf] %vm46_vm2, %v45_v6 }
  0xf6   :  { %v52_v7 = vpop.permute.xlu0 %51 }
  0xf7   :  { %58 = vst.msk [vmem:[%s117_s3] sm:$0xff] %vm57_vm3, %v52_v7 }
  0xfe   :  { %v54_v8 = vpop.permute.xlu0 %53 }
  0xff   :  { %59 = vst.msk [vmem:[%s117_s3 + $0x8] sm:$0xff] %vm57_vm3, %v54_v8 }

// kernel: gat_forward.9
= control target key start
LH: loop header
LB: loop body
LE: loop exit
PB: predicated region body
PF: predicated region fallthrough
CT: control target
= control target key end

     0   :  { %vm37_vm0 = vcmask 261120   ;;  %vm57_vm1 = vcmask 257024   ;;  %s96_s18 = smov 96   ;;  %vm68_vm2 = vcmask 64512   ;;  %s138_s1 = inlined_call_operand.vmem [shape: bf16[32,40], index: 1, kind: input, shape index: {}]   ;;  %s139_s0 = inlined_call_operand.vmem [shape: bf16[16,32], index: 0, kind: input, shape index: {}]   ;;  %s140_s2 = inlined_call_operand.vmem [shape: bf16[16,32], index: 2, kind: output, shape index: {0}]   ;;  %s141_s3 = inlined_call_operand.vmem [shape: f32[16,8], index: 3, kind: output, shape index: {1}]  }
   0x1   :  { %v94_v0 = vld [vmem:[%s138_s1 + $0x8] sm:$0xff]  ;;  %v93_v1 = vld [vmem:[%s138_s1] sm:$0xff] }
   0x2   :  { %47 = vmatpush.bf16.msra.mxu0 %v94_v0  ;;  %v92_v2 = vld [vmem:[%s139_s0] sm:$0xff] }
   0x6   :  { %48 = vmatpush.bf16.msra.mxu0 %v93_v1 }
   0x9   :  { %91 = vmatmul.msk.bf16.vlgmr.msra.gmra.mxu0 %vm37_vm0, %v92_v2 }
  0x86   :  { %v50_v3 = vpop.f32.mrf.mxu0 }
  0x87   :  { %v55_v4 = vpack.c.bf16 %v50_v3, %v50_v3  ;;  %62 = vrot.lane.b32.xlu0 %v50_v3, %s96_s18 }
  0x89   :  { %58 = vst.msk [vmem:[%s140_s2] sm:$0xf] %vm57_vm1, %v55_v4 }
  0x8e   :  { %v52_v5 = vpop.f32.mrf.mxu0 }
  0x8f   :  { %v56_v6 = vpack.c.bf16 %v52_v5, %v52_v5  ;;  %64 = vrot.lane.b32.xlu0 %v52_v5, %s96_s18 }
  0x91   :  { %59 = vst.msk [vmem:[%s140_s2 + $0x4] sm:$0xf] %vm57_vm1, %v56_v6 }
  0xf9   :  { %v63_v7 = vpop.permute.xlu0 %62 }
  0xfa   :  { %69 = vst.msk [vmem:[%s141_s3] sm:$0xff] %vm68_vm2, %v63_v7 }
 0x101   :  { %v65_v8 = vpop.permute.xlu0 %64 }
 0x102   :  { %70 = vst.msk [vmem:[%s141_s3 + $0x8] sm:$0xff] %vm68_vm2, %v65_v8 }

// kernel: gat_forward.8
= control target key start
LH: loop header
LB: loop body
LE: loop exit
PB: predicated region body
PF: predicated region fallthrough
CT: control target
= control target key end

     0   :  { %s744_s24 = smov 0   ;;  %s832_s0 = inlined_call_operand.vmem [shape: s8[16,16], index: 0, kind: input, shape index: {}]   ;;  %s833_s1 = inlined_call_operand.vmem [shape: f32[16,4], index: 1, kind: input, shape index: {}]   ;;  %s834_s2 = inlined_call_operand.vmem [shape: f32[4,16], index: 2, kind: input, shape index: {}]   ;;  %s835_s3 = inlined_call_operand.vmem [shape: bf16[16,32], index: 3, kind: input, shape index: {}]   ;;  %s836_s4 = inlined_call_operand.vmem [shape: f32[4,8], index: 4, kind: input, shape index: {}]   ;;  %s837_s5 = inlined_call_operand.vmem [shape: f32[4,8], index: 5, kind: input, shape index: {}]   ;;  %s838_s6 = inlined_call_operand.vmem [shape: f32[4,8], index: 6, kind: input, shape index: {}]   ;;  %s839_s7 = inlined_call_operand.vmem [shape: f32[16,32], index: 7, kind: output, shape index: {}]  }
   0x1 LB: > { %s615_s25 = sadd.s32 4294967295, %s691_s24   ;;  %p619_p0 = scmp.ge.s32.totalorder %s691_s24, 1  ;;  %s691_s24 = sphi %s744_s24, %s17_s24  }
   0x2   : > { %p245_p1 = scmp.lt.s32.totalorder %s691_s24, 3 }
   0x4   : > { %p246_p2 = pnand %p619_p0, %p245_p1 }
   0x5   : > { %p279_p3 = scmp.lt.s32.totalorder (!%p246_p2), %s615_s25, 1  ;;  %s697_s9 = smov (!%p246_p2), 104  }
   0x6   : > { %249 = sbr.rel (%p246_p2) target bundleno = 540 (0x21c), region = 48  ;;  %s698_s10 = smov (!%p246_p2), 120  }
   0x7   : > { %s700_s17 = smov (!%p246_p2), 112   ;;  %s703_s26 = smov (!%p246_p2), 24  }
   0xb   : > { %v755_v0 = vld [vmem:[%s835_s3] sm:$0xff]  ;;  %v693_v1 = vmov 2   ;;  %v694_v2 = vmov 1   ;;  %s841_s25 = smov (!%p279_p3, %s615_s25), 1  ;;  %v695_v4 = vmov 0   ;;  %v696_v5 = vmov 3  }
   0xc   : > { %653 = vset.pattern.permute.xlu0 %v693_v1  ;;  %655 = vset.pattern.permute.xlu1 %v694_v2  ;;  %s621_s28 = sshll.u32 %s841_s25, 3  ;;  %s620_s11 = sshll.u32 %s841_s25, 1  ;;  %v298_v8 = vld [vmem:[%s834_s2] sm:$0xf]  ;;  %v699_v16 = vmov -1e+30  }
   0xd   : > { %345 = vmatpush.bf16.msra.mxu0 %v755_v0  ;;  %s286_s8 = scalar_lea.vmem %s833_s1, %s621_s28  ;;  %s282_s14 = scalar_lea.vmem %s832_s0, %s620_s11  ;;  %v368_v10 = vperm.slane %v298_v8, 1  ;;  %v430_v11 = vperm.slane %v298_v8, 2  ;;  %vm312_vm3 = vcmask 130048   ;;  %v306_v22 = vperm.slane %v298_v8, 0 }
   0xe   : > { %v297_v3 = vld [vmem:[%s286_s8] sm:$0xff]  ;;  %v492_v23 = vperm.slane %v298_v8, 3  ;;  %s290_s30 = scalar_lea.vmem %s839_s7, %s621_s28  ;;  %vm362_vm6 = vcmask 64512   ;;  %vm424_vm7 = vcmask 130112   ;;  %vm486_vm8 = vcmask 195712  }
   0xf   : > { %365 = vperm.xlu1 %655, %v297_v3   ;;  %427 = vperm.xlu0 %653, %v297_v3   ;;  %v292_v6 = vld [vmem:[%s282_s14] sm:$0x3]  ;;  %vm548_vm9 = vcmask 261312  }
  0x10   : > { %v293_v7 = vunpack.c.0.s8 %v292_v6 }
  0x12   : > { %v294_v9 = vcvt.s32.f32 %v293_v7 }
  0x14   : > { %vm295_vm0 = vcmp.gt.f32.partialorder %v294_v9, 0.5 }
  0x15   : > { %v296_v17 = vsel %vm295_vm0, 0.0, %v699_v16 }
  0x17   : > { %656 = vset.pattern.permute.xlu1 %v695_v4  ;;  %654 = vset.pattern.permute.xlu0 %v696_v5 }
  0x18   : > { %303 = vperm.xlu1 %656, %v297_v3   ;;  %489 = vperm.xlu0 %654, %v297_v3  }
  0x20   : > { %514 = vrot.lane.b32.xlu0 %v755_v0, %s697_s9 }
  0x28   : > { %390 = vrot.lane.b32.xlu0 %v755_v0, %s698_s10  ;;  %s701_s10 = smov 8  }
  0x81   : > { %v366_v12 = vpop.permute.xlu1 %365  ;;  %v428_v13 = vpop.permute.xlu0 %427 }
  0x82   : > { %v369_v14 = vadd.f32 %v368_v10, %v366_v12  ;;  %v431_v15 = vadd.f32 %v430_v11, %v428_v13 }
  0x84   : > { %vm370_vm1 = vcmp.gt.f32.partialorder %v369_v14, 0.0  ;;  %v371_v18 = vmul.f32 0.2, %v369_v14  ;;  %v433_v19 = vmul.f32 0.2, %v431_v15  ;;  %vm432_vm2 = vcmp.gt.f32.partialorder %v431_v15, 0.0 }
  0x86   : > { %v434_v20 = vsel %vm432_vm2, %v431_v15, %v433_v19  ;;  %v372_v21 = vsel %vm370_vm1, %v369_v14, %v371_v18 }
  0x87   : > { %v435_v24 = vadd.f32 %v434_v20, %v296_v17  ;;  %v373_v25 = vadd.f32 %v372_v21, %v296_v17 }
  0x89   : > { %v436_v26 = vsel %vm312_vm3, %v435_v24, -inf  ;;  %v374_v27 = vsel %vm312_vm3, %v373_v25, -inf }
  0x8a   : > { %v304_v28 = vpop.permute.xlu1 %303  ;;  %v490_v29 = vpop.permute.xlu0 %489  ;;  %437 = vmax.xlane.f32.xlu2 %v436_v26  ;;  %375 = vmax.xlane.f32.xlu1 %v374_v27 }
  0x8b   : > { %v307_v30 = vadd.f32 %v306_v22, %v304_v28  ;;  %v493_v31 = vadd.f32 %v492_v23, %v490_v29 }
  0x8d   : > { %vm308_vm4 = vcmp.gt.f32.partialorder %v307_v30, 0.0  ;;  %v309_v32 = vmul.f32 0.2, %v307_v30  ;;  %vm494_vm5 = vcmp.gt.f32.partialorder %v493_v31, 0.0  ;;  %v495_v33 = vmul.f32 0.2, %v493_v31 }
  0x8f   : > { %v496_v34 = vsel %vm494_vm5, %v493_v31, %v495_v33  ;;  %v310_v35 = vsel %vm308_vm4, %v307_v30, %v309_v32  ;;  %v658_v30 = vld [vmem:[%s837_s5 + $0x1] ss:$0 sm:$0xff]  ;;  %v659_v31 = vld [vmem:[%s836_s4 + $0x2] ss:$0 sm:$0xff] }
  0x90   : > { %v497_v36 = vadd.f32 %v496_v34, %v296_v17  ;;  %v311_v37 = vadd.f32 %v310_v35, %v296_v17 }
  0x92   : > { %v498_v38 = vsel %vm312_vm3, %v497_v36, -inf  ;;  %v313_v39 = vsel %vm312_vm3, %v311_v37, -inf  ;;  %v515_v40 = vpop.permute.xlu0 %514 }
  0x93   : > { %499 = vmax.xlane.f32.xlu2 %v498_v38  ;;  %314 = vmax.xlane.f32.xlu0 %v313_v39 }
  0x94   : > { %527 = vmatpush.bf16.msra.mxu3 %v515_v40  ;;  %v660_v40 = vld [vmem:[%s837_s5 + $0x2] ss:$0 sm:$0xff] }
  0x9a   : > { %v391_v41 = vpop.permute.xlu0 %390 }
  0x9b   : > { %403 = vmatpush.bf16.msra.mxu1 %v391_v41 }
  0xab   : > { %452 = vrot.lane.b32.xlu2 %v755_v0, %s700_s17  ;;  %s702_s17 = smov 16  }
  0xfd   : > { %v438_v42 = vpop.xlane.xlu2 %437  ;;  %v376_v43 = vpop.xlane.xlu1 %375 }
  0xfe   : > { %v439_v44 = vmax.f32 %v438_v42, -10000.0  ;;  %v377_v45 = vmax.f32 %v376_v43, -10000.0 }
 0x100   : > { %v440_v46 = vsub.f32 %v435_v24, %v439_v44  ;;  %v378_v47 = vsub.f32 %v373_v25, %v377_v45  ;;  %v657_v24 = vld [vmem:[%s836_s4 + $0x1] ss:$0 sm:$0xff] }
 0x102   : > { %v441_v48 = vpack.c.bf16 %v440_v46, %v440_v46  ;;  %v379_v49 = vpack.c.bf16 %v378_v47, %v378_v47  ;;  %v666_v46 = vld [vmem:[%s838_s6 + $0x2] ss:$0 sm:$0xff] }
 0x104   : > { %v442_v50 = vunpack.c.l.bf16 %v441_v48  ;;  %v380_v51 = vunpack.c.l.bf16 %v379_v49  ;;  %v664_v48 = vld [vmem:[%s836_s4 + $0x3] ss:$0 sm:$0xff] }
 0x106   : > { %v443_v52 = vmul.f32 1.442695, %v442_v50  ;;  %v381_v53 = vmul.f32 1.442695, %v380_v51  ;;  %v500_v54 = vpop.xlane.xlu2 %499  ;;  %v315_v55 = vpop.xlane.xlu0 %314 }
 0x107   : > { %v501_v56 = vmax.f32 %v500_v54, -10000.0  ;;  %v316_v57 = vmax.f32 %v315_v55, -10000.0  ;;  %v661_v54 = vld [vmem:[%s836_s4] ss:$0 sm:$0xff] }
 0x108   : > { %669 = vpow2.f32 %v443_v52 }
 0x109   : > { %671 = vpow2.f32 %v381_v53  ;;  %v502_v58 = vsub.f32 %v497_v36, %v501_v56  ;;  %v317_v59 = vsub.f32 %v311_v37, %v316_v57  ;;  %v663_v36 = vld [vmem:[%s838_s6 + $0x1] ss:$0 sm:$0xff]  ;;  %v665_v56 = vld [vmem:[%s837_s5 + $0x3] ss:$0 sm:$0xff] }
 0x10b   : > { %v503_v60 = vpack.c.bf16 %v502_v58, %v502_v58  ;;  %v318_v61 = vpack.c.bf16 %v317_v59, %v317_v59 }
 0x10d   : > { %v504_v62 = vunpack.c.l.bf16 %v503_v60  ;;  %v319_v63 = vunpack.c.l.bf16 %v318_v61  ;;  %v667_v61 = vld [vmem:[%s838_s6 + $0x3] ss:$0 sm:$0xff] }
 0x10e   : > { %v670_v0 = vpop.eup %669  ;;  %v453_v1 = vpop.permute.xlu2 %452 }
 0x10f   : > { %v672_v2 = vpop.eup %671  ;;  %v505_v3 = vmul.f32 1.442695, %v504_v62  ;;  %v320_v4 = vmul.f32 1.442695, %v319_v63  ;;  %465 = vmatpush.bf16.msra.mxu2 %v453_v1  ;;  %v445_v5 = vpack.c.bf16 %v670_v0, %v670_v0  ;;  %v662_v62 = vld [vmem:[%s837_s5] ss:$0 sm:$0xff] }
 0x110   : > { %v383_v6 = vpack.c.bf16 %v672_v2, %v672_v2 }
 0x111   : > { %673 = vpow2.f32 %v505_v3  ;;  %v446_v7 = vunpack.c.l.bf16 %v445_v5 }
 0x112   : > { %675 = vpow2.f32 %v320_v4  ;;  %628 = vmatmul.msk.bf16.vlgmr.msra.gmra.mxu1 %vm312_vm3, %v383_v6  ;;  %629 = vmatmul.msk.bf16.vlgmr.msra.gmra.mxu2 %vm312_vm3, %v445_v5  ;;  %v384_v8 = vunpack.c.l.bf16 %v383_v6  ;;  %v668_v4 = vld [vmem:[%s838_s6] ss:$0 sm:$0xff] }
 0x113   : > { %v447_v9 = vsel %vm312_vm3, %v446_v7, 0.0 }
 0x114   : > { %448 = vadd.xlane.f32.xlu1 %v447_v9  ;;  %v385_v10 = vsel %vm312_vm3, %v384_v8, 0.0 }
 0x115   : > { %386 = vadd.xlane.f32.xlu2 %v385_v10 }
 0x117   : > { %v674_v11 = vpop.eup %673 }
 0x118   : > { %v676_v12 = vpop.eup %675  ;;  %v507_v13 = vpack.c.bf16 %v674_v11, %v674_v11 }
 0x119   : > { %v322_v14 = vpack.c.bf16 %v676_v12, %v676_v12 }
 0x11a   : > { %630 = vmatmul.msk.bf16.vlgmr.msra.gmra.mxu3 %vm312_vm3, %v507_v13  ;;  %v508_v15 = vunpack.c.l.bf16 %v507_v13 }
 0x11b   : > { %627 = vmatmul.msk.bf16.vlgmr.msra.gmra.mxu0 %vm312_vm3, %v322_v14  ;;  %v323_v17 = vunpack.c.l.bf16 %v322_v14 }
 0x11c   : > { %v509_v16 = vsel %vm312_vm3, %v508_v15, 0.0 }
 0x11d   : > { %510 = vadd.xlane.f32.xlu1 %v509_v16  ;;  %v324_v18 = vsel %vm312_vm3, %v323_v17, 0.0 }
 0x125   : > { %325 = vadd.xlane.f32.xlu1 %v324_v18 }
 0x187   : > { %v449_v19 = vpop.xlane.xlu1 %448 }
 0x188   : > { %v387_v20 = vpop.xlane.xlu2 %386  ;;  %v450_v22 = vmax.f32 %v449_v19, 1e-30 }
 0x189   : > { %v388_v21 = vmax.f32 %v387_v20, 1e-30 }
 0x18b   : > { %677 = vrcp.f32 %v388_v21 }
 0x18c   : > { %679 = vrcp.f32 %v450_v22 }
 0x18f   : > { %v405_v23 = vpop.f32.mrf.mxu1 }
 0x190   : > { %v511_v25 = vpop.xlane.xlu1 %510 }
 0x191   : > { %v678_v26 = vpop.eup %677  ;;  %v512_v28 = vmax.f32 %v511_v25, 1e-30 }
 0x192   : > { %v409_v27 = vmul.f32 %v678_v26, %v405_v23  ;;  %v680_v32 = vpop.eup %679 }
 0x193   : > { %681 = vrcp.f32 %v512_v28 }
 0x194   : > { %v412_v29 = vadd.f32 %v657_v24, %v409_v27 }
 0x195   : > { %v467_v33 = vpop.f32.mrf.mxu2 }
 0x196   : > { %v413_v34 = vmax.f32 %v412_v29, 0.0  ;;  %v471_v35 = vmul.f32 %v680_v32, %v467_v33 }
 0x197   : > { %v407_v37 = vpop.f32.mrf.mxu1 }
 0x198   : > { %v416_v38 = vmul.f32 %v658_v30, %v413_v34  ;;  %v474_v39 = vadd.f32 %v659_v31, %v471_v35  ;;  %v347_v41 = vpop.f32.mrf.mxu0  ;;  %v326_v42 = vpop.xlane.xlu1 %325 }
 0x199   : > { %v327_v43 = vmax.f32 %v326_v42, 1e-30  ;;  %v682_v49 = vpop.eup %681 }
 0x19a   : > { %v475_v44 = vmax.f32 %v474_v39, 0.0  ;;  %v419_v45 = vadd.f32 %v663_v36, %v416_v38 }
 0x19b   : > { %683 = vrcp.f32 %v327_v43 }
 0x19c   : > { %v478_v47 = vmul.f32 %v660_v40, %v475_v44  ;;  %421 = vrot.lane.b32.xlu2 %v419_v45, %s701_s10 }
 0x19d   : > { %v469_v50 = vpop.f32.mrf.mxu2  ;;  %v529_v51 = vpop.f32.mrf.mxu3 }
 0x19e   : > { %v533_v52 = vmul.f32 %v682_v49, %v529_v51  ;;  %v481_v53 = vadd.f32 %v666_v46, %v478_v47 }
 0x1a0   : > { %v536_v55 = vadd.f32 %v664_v48, %v533_v52  ;;  %v349_v57 = vpop.f32.mrf.mxu0  ;;  %483 = vrot.lane.b32.xlu0 %v481_v53, %s702_s17 }
 0x1a1   : > { %v684_v58 = vpop.eup %683 }
 0x1a2   : > { %v351_v59 = vmul.f32 %v684_v58, %v347_v41  ;;  %v537_v60 = vmax.f32 %v536_v55, 0.0 }
 0x1a4   : > { %v354_v63 = vadd.f32 %v661_v54, %v351_v59  ;;  %v540_v0 = vmul.f32 %v665_v56, %v537_v60 }
 0x1a5   : > { %v531_v1 = vpop.f32.mrf.mxu3 }
 0x1a6   : > { %v355_v2 = vmax.f32 %v354_v63, 0.0  ;;  %v543_v3 = vadd.f32 %v667_v61, %v540_v0 }
 0x1a8   : > { %v358_v5 = vmul.f32 %v662_v62, %v355_v2  ;;  %545 = vrot.lane.b32.xlu1 %v543_v3, %s703_s26 }
 0x1aa   : > { %v361_v6 = vadd.f32 %v668_v4, %v358_v5 }
 0x1ac   : > { %363 = vst.msk [vmem:[%s290_s30] sm:$0xff] %vm362_vm6, %v361_v6 }
 0x1f6   : > { %v422_v7 = vpop.permute.xlu2 %421 }
 0x1f7   : > { %425 = vst.msk [vmem:[%s290_s30] sm:$0xff] %vm424_vm7, %v422_v7 }
 0x212   : > { %v484_v8 = vpop.permute.xlu0 %483 }
 0x213   : > { %487 = vst.msk [vmem:[%s290_s30] sm:$0xff] %vm486_vm8, %v484_v8 }
 0x21a   : > { %v546_v9 = vpop.permute.xlu1 %545 }
 0x21b   : > { %549 = vst.msk [vmem:[%s290_s30] sm:$0xff] %vm548_vm9, %v546_v9 }
 0x21c PF: > { %s17_s24 = sadd.s32 1, %s691_s24  }
 0x21d   : > { %p14_p4 = scmp.ge.s32.totalorder %s17_s24, 4  }
 0x21f   :  { %16 = sbr.rel (!%p14_p4) target bundleno = 1 (0x1), region = 81 }

// kernel: gat_forward.11
= control target key start
LH: loop header
LB: loop body
LE: loop exit
PB: predicated region body
PF: predicated region fallthrough
CT: control target
= control target key end

     0   :  { %vm37_vm0 = vcmask 261120   ;;  %vm57_vm1 = vcmask 60416   ;;  %s96_s18 = smov 120   ;;  %vm68_vm2 = vcmask 15360   ;;  %s138_s1 = inlined_call_operand.vmem [shape: bf16[32,10], index: 1, kind: input, shape index: {}]   ;;  %s139_s0 = inlined_call_operand.vmem [shape: bf16[16,32], index: 0, kind: input, shape index: {}]   ;;  %s140_s2 = inlined_call_operand.vmem [shape: bf16[16,8], index: 2, kind: output, shape index: {0}]   ;;  %s141_s3 = inlined_call_operand.vmem [shape: f32[16,2], index: 3, kind: output, shape index: {1}]  }
   0x1   :  { %v94_v0 = vld [vmem:[%s138_s1 + $0x8] sm:$0xff]  ;;  %v93_v1 = vld [vmem:[%s138_s1] sm:$0xff] }
   0x2   :  { %47 = vmatpush.bf16.msra.mxu0 %v94_v0  ;;  %v92_v2 = vld [vmem:[%s139_s0] sm:$0xff] }
   0x6   :  { %48 = vmatpush.bf16.msra.mxu0 %v93_v1 }
   0x9   :  { %91 = vmatmul.msk.bf16.vlgmr.msra.gmra.mxu0 %vm37_vm0, %v92_v2 }
  0x86   :  { %v50_v3 = vpop.f32.mrf.mxu0 }
  0x87   :  { %v55_v4 = vpack.c.bf16 %v50_v3, %v50_v3  ;;  %62 = vrot.lane.b32.xlu0 %v50_v3, %s96_s18 }
  0x89   :  { %58 = vst.msk [vmem:[%s140_s2] sm:$0xf] %vm57_vm1, %v55_v4 }
  0x8e   :  { %v52_v5 = vpop.f32.mrf.mxu0 }
  0x8f   :  { %v56_v6 = vpack.c.bf16 %v52_v5, %v52_v5  ;;  %64 = vrot.lane.b32.xlu0 %v52_v5, %s96_s18 }
  0x91   :  { %59 = vst.msk [vmem:[%s140_s2 + $0x4] sm:$0xf] %vm57_vm1, %v56_v6 }
  0xf9   :  { %v63_v7 = vpop.permute.xlu0 %62 }
  0xfa   :  { %69 = vst.msk [vmem:[%s141_s3] sm:$0xff] %vm68_vm2, %v63_v7 }
 0x101   :  { %v65_v8 = vpop.permute.xlu0 %64 }
 0x102   :  { %70 = vst.msk [vmem:[%s141_s3 + $0x8] sm:$0xff] %vm68_vm2, %v65_v8 }

// kernel: gat_forward.12
= control target key start
LH: loop header
LB: loop body
LE: loop exit
PB: predicated region body
PF: predicated region fallthrough
CT: control target
= control target key end

     0   :  { %s522_s24 = smov 0   ;;  %s568_s0 = inlined_call_operand.vmem [shape: s8[16,16], index: 0, kind: input, shape index: {}]   ;;  %s569_s1 = inlined_call_operand.vmem [shape: f32[16,1], index: 1, kind: input, shape index: {}]   ;;  %s570_s2 = inlined_call_operand.vmem [shape: f32[1,16], index: 2, kind: input, shape index: {}]   ;;  %s571_s3 = inlined_call_operand.vmem [shape: bf16[16,8], index: 3, kind: input, shape index: {}]   ;;  %s572_s4 = inlined_call_operand.vmem [shape: f32[1,8], index: 4, kind: input, shape index: {}]   ;;  %s573_s5 = inlined_call_operand.vmem [shape: f32[1,8], index: 5, kind: input, shape index: {}]   ;;  %s574_s6 = inlined_call_operand.vmem [shape: f32[1,8], index: 6, kind: input, shape index: {}]   ;;  %s575_s7 = inlined_call_operand.vmem [shape: f32[16,8], index: 7, kind: output, shape index: {}]  }
   0x1 LB: > { %s437_s25 = sadd.s32 4294967295, %s478_s24   ;;  %p441_p0 = scmp.ge.s32.totalorder %s478_s24, 1  ;;  %s478_s24 = sphi %s522_s24, %s17_s24  }
   0x2   : > { %p245_p1 = scmp.lt.s32.totalorder %s478_s24, 3 }
   0x4   : > { %p246_p2 = pnand %p441_p0, %p245_p1 }
   0x5   : > { %p279_p3 = scmp.lt.s32.totalorder (!%p246_p2), %s437_s25, 1 }
   0x6   : > { %249 = sbr.rel (%p246_p2) target bundleno = 412 (0x19c), region = 48 }
   0xb   : > { %v480_v0 = vmov 0   ;;  %s577_s25 = smov (!%p279_p3, %s437_s25), 1  ;;  %v464_v5 = vld [vmem:[%s570_s2] ss:$0 sm:$0xff]  ;;  %v481_v9 = vmov -1e+30  }
   0xc   : > { %463 = vset.pattern.permute.xlu0 %v480_v0  ;;  %s443_s26 = sshll.u32 %s577_s25, 3  ;;  %s442_s30 = sshll.u32 %s577_s25, 1  ;;  %vm314_vm2 = vcmask 130048   ;;  %v452_v14 = vld [vmem:[%s571_s3] sm:$0xff]  ;;  %vm370_vm3 = vcmask 64512  }
   0xd   : > { %s286_s29 = scalar_lea.vmem %s569_s1, %s443_s26  ;;  %s282_s10 = scalar_lea.vmem %s568_s0, %s442_s30  ;;  %347 = vmatpush.bf16.msra.mxu0 %v452_v14  ;;  %v465_v28 = vld [vmem:[%s572_s4] ss:$0 sm:$0xff] }
   0xe   : > { %v297_v1 = vld [vmem:[%s286_s29] sm:$0xff]  ;;  %s290_s23 = scalar_lea.vmem %s575_s7, %s443_s26 }
   0xf   : > { %303 = vperm.xlu0 %463, %v297_v1   ;;  %v292_v2 = vld [vmem:[%s282_s10] sm:$0x3] }
  0x10   : > { %v293_v3 = vunpack.c.0.s8 %v292_v2  ;;  %v466_v32 = vld [vmem:[%s573_s5] ss:$0 sm:$0xff] }
  0x11   : > { %v467_v34 = vld [vmem:[%s574_s6] ss:$0 sm:$0xff] }
  0x12   : > { %v294_v4 = vcvt.s32.f32 %v293_v3 }
  0x14   : > { %vm295_vm0 = vcmp.gt.f32.partialorder %v294_v4, 0.5 }
  0x15   : > { %v296_v10 = vsel %vm295_vm0, 0.0, %v481_v9 }
  0x81   : > { %v304_v6 = vpop.permute.xlu0 %303 }
  0x82   : > { %v309_v7 = vadd.f32 %v464_v5, %v304_v6 }
  0x84   : > { %vm310_vm1 = vcmp.gt.f32.partialorder %v309_v7, 0.0  ;;  %v311_v8 = vmul.f32 0.2, %v309_v7 }
  0x86   : > { %v312_v11 = vsel %vm310_vm1, %v309_v7, %v311_v8 }
  0x87   : > { %v313_v12 = vadd.f32 %v312_v11, %v296_v10 }
  0x89   : > { %v315_v13 = vsel %vm314_vm2, %v313_v12, -inf }
  0x8a   : > { %316 = vmax.xlane.f32.xlu0 %v315_v13 }
  0xfd   : > { %v317_v15 = vpop.xlane.xlu0 %316 }
  0xfe   : > { %v318_v16 = vmax.f32 %v317_v15, -10000.0 }
 0x100   : > { %v319_v17 = vsub.f32 %v313_v12, %v318_v16 }
 0x102   : > { %v320_v18 = vpack.c.bf16 %v319_v17, %v319_v17 }
 0x104   : > { %v321_v19 = vunpack.c.l.bf16 %v320_v18 }
 0x106   : > { %v322_v20 = vmul.f32 1.442695, %v321_v19 }
 0x108   : > { %468 = vpow2.f32 %v322_v20 }
 0x10e   : > { %v469_v21 = vpop.eup %468 }
 0x10f   : > { %v324_v22 = vpack.c.bf16 %v469_v21, %v469_v21 }
 0x111   : > { %449 = vmatmul.msk.bf16.vlgmr.msra.gmra.mxu0 %vm314_vm2, %v324_v22  ;;  %v325_v23 = vunpack.c.l.bf16 %v324_v22 }
 0x113   : > { %v326_v24 = vsel %vm314_vm2, %v325_v23, 0.0 }
 0x114   : > { %327 = vadd.xlane.f32.xlu1 %v326_v24 }
 0x187   : > { %v328_v25 = vpop.xlane.xlu1 %327 }
 0x188   : > { %v329_v26 = vmax.f32 %v328_v25, 1e-30 }
 0x18a   : > { %470 = vrcp.f32 %v329_v26 }
 0x18e   : > { %v349_v27 = vpop.f32.mrf.mxu0 }
 0x190   : > { %v471_v29 = vpop.eup %470 }
 0x191   : > { %v353_v30 = vmul.f32 %v471_v29, %v349_v27 }
 0x193   : > { %v358_v31 = vadd.f32 %v465_v28, %v353_v30 }
 0x195   : > { %v359_v33 = vmax.f32 %v358_v31, 0.0 }
 0x196   : > { %v351_v35 = vpop.f32.mrf.mxu0 }
 0x197   : > { %v364_v36 = vmul.f32 %v466_v32, %v359_v33 }
 0x199   : > { %v369_v37 = vadd.f32 %v467_v34, %v364_v36 }
 0x19b   : > { %371 = vst.msk [vmem:[%s290_s23] sm:$0xff] %vm370_vm3, %v369_v37 }
 0x19c PF: > { %s17_s24 = sadd.s32 1, %s478_s24  }
 0x19d   : > { %p14_p4 = scmp.ge.s32.totalorder %s17_s24, 4  }
 0x19f   :  { %16 = sbr.rel (!%p14_p4) target bundleno = 1 (0x1), region = 81 }

// kernel: gat_forward.13
= control target key start
LH: loop header
LB: loop body
LE: loop exit
PB: predicated region body
PF: predicated region fallthrough
CT: control target
= control target key end

     0   :  { %vm23_vm0 = vcmask 58368   ;;  %v140_v1 = vmov 0.0   ;;  %s182_s0 = inlined_call_operand.vmem [shape: bf16[2,16], index: 0, kind: input, shape index: {}]   ;;  %s183_s1 = inlined_call_operand.vmem [shape: bf16[16,8], index: 1, kind: input, shape index: {}]   ;;  %s184_s2 = inlined_call_operand.vmem [shape: bf16[8,3], index: 2, kind: input, shape index: {}]   ;;  %s185_s3 = inlined_call_operand.vmem [shape: f32[1,3], index: 3, kind: input, shape index: {}]   ;;  %s186_s4 = inlined_call_operand.hbm [shape: f32[2,3], index: 4, kind: output, shape index: {}]  }
   0x1   :  { %v110_v0 = vld [vmem:[%s183_s1] sm:$0xff]  ;;  %24 = vst.msk [vmem:[#allocation2] sm:$0x3] %vm23_vm0, %v140_v1 }
   0x2   :  { %9 = vsyncpa [#allocation4], 0  ;;  %46 = vmatpush.bf16.msra.mxu0 %v110_v0  ;;  %v26_v2 = vld [vmem:[%s182_s0] sm:$0x1]  ;;  %vm35_vm1 = vcmask 130048   ;;  %vm69_vm2 = vcmask 1043456  }
   0x3   :  { %v60_v3 = vld [vmem:[%s184_s2] sm:$0xf]  ;;  %vm65_vm3 = vcmask 64512   ;;  %s141_s21 = smov [#allocation3]   ;;  %s95_s24 = sshll.u32 %s186_s4, 4  ;;  %vm86_vm4 = vcmask 17408   ;;  %s96_s24 = int_to_ptr.hbm [resolvable:$true] %s95_s24 }
   0x4   :  { %v71_v4 = vsel %vm69_vm2, %v60_v3, 0  ;;  %v113_v11 = vld [vmem:[%s185_s3] ss:$0 sm:$0xff]  ;;  %s93_s22 = sshll.u32 %s141_s21, 4  ;;  %s94_s22 = int_to_ptr.vmem [resolvable:$true] %s93_s22 }
   0x5   :  { %108 = vmatmul.msk.bf16.vlgmr.msra.gmra.mxu0 %vm35_vm1, %v26_v2  ;;  %80 = vmatpush.bf16.msra.mxu1 %v71_v4 }
   0x8   :  { %v25_v5 = vld [vmem:[#allocation2] sm:$0x3] }
  0x82   :  { %v48_v6 = vpop.f32.mrf.mxu0 }
  0x83   :  { %v52_v7 = vadd.f32 %v48_v6, %v25_v5 }
  0x85   :  { %54 = vst.msk [vmem:[#allocation2] sm:$0x3] %vm23_vm0, %v52_v7 }
  0x8a   :  { %v50_v8 = vpop.f32.mrf.mxu0 }
  0x8c   :  { %v58_v9 = vld [vmem:[#allocation2] sm:$0x3] }
  0x8d   :  { %v59_v10 = vpack.c.bf16 %v58_v9, %v58_v9 }
  0x8f   :  { %109 = vmatmul.msk.bf16.vlgmr.msra.gmra.mxu1 %vm65_vm3, %v59_v10 }
 0x10c   :  { %v82_v12 = vpop.f32.mrf.mxu1 }
 0x10d   :  { %v83_v13 = vadd.f32 %v113_v11, %v82_v12 }
 0x10f   :  { %87 = vst.msk [vmem:[#allocation3] sm:$0x3] %vm86_vm4, %v83_v13 }
 0x110   :  { %98 = dma.vmem_to_hbm [thread:$0]  %s94_s22, 32, %s96_s24, [#allocation4]  }
 0x114   :  { %v84_v14 = vpop.f32.mrf.mxu1 }
 0x115   :  { %138 = dma.done.wait [#allocation4], 32  }
 0x116   :  { %139 = vsyncadd [#allocation4], 4294967264 }
 0x117   :  { %103 = vsyncpa [#allocation4], 1 }

</bundles_post_ra>
